<compile_context>
chip_gen: v7x
topology: tpu7x:2x2x1
jax: 0.10.0
libtpu: 0.0.40
codegen_flags: <defaults>
</compile_context>

<pallas_src>
import functools

import numpy as np
import jax
import jax.numpy as jnp
from jax.experimental import pallas as pl
from jax.experimental.pallas import tpu as pltpu

EPS = 1e-5
BN_SCALE = float(1.0 / np.sqrt(1.0 + EPS))  # eval-mode BN with freshly-init stats
W_SUBLANE = 16                              # bf16 sublane packing for weight-slab rows


# --------------------------------------------------------------------------- kernel
def _fused_pointnet_kernel(xyz_ref, w_ref, b_ref, out_ref, t_scr,
                           *, layers, batch, n_pts, k_feat):
    """Entire PointNetClassifier forward in one kernel.

    xyz_ref : (B*N, 3) f32 point cloud, channels-last.
    w_ref   : (R, LANES) bf16 packed weight slab (per-layer row blocks).
    b_ref   : (n_layers, LANES) f32 packed bias slab (one row per layer).
    out_ref : (B, 1) f32 classifier output.
    t_scr   : (k_feat*B, k_feat) f32 VMEM scratch for the feature transform.
    """
    B, N = batch, n_pts

    def dense(x2d, name):
        """(M, Cin) f32 -> (M, Cout) f32, weights/bias loaded at point of use from the
        packed slabs.  MXU (bf16 in / f32 acc) for wide Cin; unrolled VPU broadcast
        mul-adds for the tiny Cin=3 layers (not worth an MXU pass)."""
        off, li, cin, cout, relu = layers[name]
        if cin <= 4:
            wf = w_ref[off:off + cin, 0:cout].astype(jnp.float32)
            y = x2d[:, 0:1] * wf[0:1, :]
            for j in range(1, cin):
                y = y + x2d[:, j:j + 1] * wf[j:j + 1, :]
        else:
            y = jnp.dot(x2d.astype(jnp.bfloat16), w_ref[off:off + cin, 0:cout],
                        preferred_element_type=jnp.float32)
        y = y + b_ref[li:li + 1, 0:cout]     # f32 epilogue (v5e has no bf16 VPU)
        if relu:
            y = jnp.maximum(y, 0.0)
        return y

    def max_over_points(x2d):
        """(B*N, C) -> (B, C): per-cloud max over points (== torch.max(x, 2)).
        N == 8 == one f32 sublane tile, so the reshape is layout-free."""
        return x2d.reshape(B, N, x2d.shape[1]).max(axis=1)

    def input_transform(x2d, t_flat):
        """Batched x @ T for k=3 (input transform): 3 VPU broadcast mul-adds per cloud."""
        k = 3
        outs = []
        for b in range(B):
            xb = x2d[b * N:(b + 1) * N, :]
            acc = xb[:, 0:1] * t_flat[b:b + 1, 0:k]
            for j in range(1, k):
                acc = acc + xb[:, j:j + 1] * t_flat[b:b + 1, j * k:(j + 1) * k]
            outs.append(acc)
        return jnp.concatenate(outs, axis=0)

    def feature_transform(x2d, t_flat):
        """Feature transform (k = ls[0]): round-trip the flat (B, k*k) transform through
        the VMEM scratch (k contiguous stores shared across the batch; scratch row
        i*B + b holds T[b, i, :]), then do the per-cloud (N, k) @ (k, k) on the MXU."""
        k = k_feat
        for i in range(k):
            t_scr[i * B:(i + 1) * B, :] = t_flat[:, i * k:(i + 1) * k]
        outs = []
        for b in range(B):
            xb = x2d[b * N:(b + 1) * N, :]                   # (N, k)
            tb = t_scr[pl.ds(b, k, stride=B), :]             # (k, k): rows b, b+B, ...
            outs.append(jnp.dot(xb, tb, preferred_element_type=jnp.float32))
        return jnp.concatenate(outs, axis=0)

    def stn(x2d, prefix):
        """STN3d / STNkd -> flat (B, k*k) transform (identity folded into fc3 bias)."""
        h = dense(x2d, prefix + "conv1")        # relu(bn(conv1))
        h = dense(h, prefix + "conv2")          # relu(bn(conv2))
        h = dense(h, prefix + "conv3")          # relu(bn(conv3))
        g = max_over_points(h)                  # torch.max(x, 2)
        g = dense(g, prefix + "fc1")            # relu(bn(fc1))
        g = dense(g, prefix + "fc2")            # relu(bn(fc2))
        return dense(g, prefix + "fc3")         # fc3 (+ iden via bias)

    xyz = xyz_ref[...]                          # (B*N, 3) f32, channels-last

    # ---- PointNetEncoder(global_feat=True, feature_transform=True) ----
    t_in = stn(xyz, "stn.")                     # (B, 9)
    x = input_transform(xyz, t_in)              # torch.bmm(x, trans)
    x = dense(x, "feat.conv1")                  # relu(bn1(conv1))
    t_ft = stn(x, "fstn.")                      # (B, k_feat*k_feat)
    x = feature_transform(x, t_ft)              # torch.bmm(x, trans_feat)
    x = dense(x, "feat.conv2")                  # relu(bn2(conv2))
    x = dense(x, "feat.conv3")                  # bn3(conv3)
    feat = max_over_points(x)                   # global max pool -> (B, ls[2])

    # ---- classifier head ----
    h = dense(feat, "fc1")                      # relu(bn1(fc1))
    # TODO(synk): nn.Dropout(p=0.4) is identity in eval mode (no RNG mask applied).
    h = dense(h, "fc2")                         # relu(bn2(dropout(fc2)))
    out_ref[...] = dense(h, "fc3").astype(out_ref.dtype)


# --------------------------------------------------------------------------- wrapper
def pointnet_classifier_forward(nodes, w_slab, b_slab, layer_meta, feat_ind,
                                *, n_pts, ls):
    """Forward of PointNetClassifier (arity==1): returns replacement 'nodes' (B, 1)."""
    B = nodes.shape[0]
    x = nodes[:, feat_ind]                      # (B, 3*n_pts)
    xyz = x.reshape(B * n_pts, 3)               # torch: view(B, -1, 3), channels-last
    kernel = functools.partial(_fused_pointnet_kernel,
                               layers=layer_meta, batch=B, n_pts=n_pts, k_feat=ls[0])
    return pl.pallas_call(
        kernel,
        out_shape=jax.ShapeDtypeStruct((B, 1), jnp.float32),
        scratch_shapes=[pltpu.VMEM((ls[0] * B, ls[0]), jnp.float32)],
    )(xyz.astype(jnp.float32), w_slab, b_slab)


# --------------------------------------------------------------------------- params
def _layer_defs(ls):
    """(name, cin, cout, bn_fold, relu, iden_k) for every Linear/Conv1d in module order."""
    l0, l1, l2 = ls

    def stn_defs(prefix, k):
        return [
            (prefix + "conv1", k,  l0, True,  True,  0),
            (prefix + "conv2", l0, l1, True,  True,  0),
            (prefix + "conv3", l1, l2, True,  True,  0),
            (prefix + "fc1",   l2, l1, True,  True,  0),
            (prefix + "fc2",   l1, l0, True,  True,  0),
            (prefix + "fc3",   l0, k * k, False, False, k),
        ]

    return (stn_defs("stn.", 3) + stn_defs("fstn.", l0) + [
        ("feat.conv1", 3,  l0, True,  True,  0),
        ("feat.conv2", l0, l1, True,  True,  0),
        ("feat.conv3", l1, l2, True,  False, 0),
        ("fc1",        l2, l1, True,  True,  0),
        ("fc2",        l1, l0, True,  True,  0),
        ("fc3",        l0, 1,  False, False, 0),
    ])


def init_param_slabs(key, ls):
    """apply_init semantics: weight ~ init_fn (N(0, 0.1) here), bias ~ U(-1, 1), BN with
    gamma=1/beta=0 and fresh running stats -> eval-mode BN folded as a 1/sqrt(1+eps)
    scale; STN identity matrices folded into the fc3 biases.  All 18 layers are packed
    into one bf16 weight slab (16-sublane-aligned per-layer row blocks) and one f32 bias
    slab, so the kernel sees 2 parameter DMAs instead of 36."""
    defs = _layer_defs(ls)
    lane_w = max(int(np.ceil(c / 128)) * 128 for _, _, c, _, _, _ in defs)
    meta = {}
    row = 0
    for i, (name, cin, cout, _, relu, _) in enumerate(defs):
        meta[name] = (row, i, cin, cout, relu)       # (row_off, layer_idx, cin, cout, relu)
        row += ((cin + W_SUBLANE - 1) // W_SUBLANE) * W_SUBLANE
    w_slab = np.zeros((row, lane_w), np.float32)
    b_slab = np.zeros((len(defs), lane_w), np.float32)

    keys = jax.random.split(key, len(defs))
    for i, (name, cin, cout, bn_fold, _, iden_k) in enumerate(defs):
        kw, kb = jax.random.split(keys[i])
        w = 0.1 * jax.random.normal(kw, (cout, cin), jnp.float32)        # init_fn(weight)
        b = jax.random.uniform(kb, (cout,), jnp.float32, -1.0, 1.0)      # uniform_(bias)
        s = BN_SCALE if bn_fold else 1.0
        off = meta[name][0]
        w_slab[off:off + cin, :cout] = np.asarray(w).T * s
        b_row = np.asarray(b) * s
        if iden_k:
            b_row = b_row + np.eye(iden_k, dtype=np.float32).reshape(-1)
        b_slab[i, :cout] = b_row

    return (jnp.asarray(w_slab, dtype=jnp.bfloat16),
            jnp.asarray(b_slab, dtype=jnp.float32),
            meta)


# --------------------------------------------------------------------------- main
if __name__ == "__main__":
    B = 2          # batch (graph nodes batched along dim 0)
    N_PTS = 8      # points per node-feature point cloud
    NODE_DIM = 32  # raw node feature dimension
    LS = (16, 32, 64)  # pointnet_ls_list

    key = jax.random.PRNGKey(0)
    k_nodes, k_params = jax.random.split(key)

    nodes = jax.random.normal(k_nodes, (B, NODE_DIM), jnp.float32)
    feat_ind = np.arange(3 * N_PTS, dtype=np.int32)  # indices selecting xyz features
    w_slab, b_slab, layer_meta = init_param_slabs(k_params, LS)

    fwd = jax.jit(lambda n: pointnet_classifier_forward(
        n, w_slab, b_slab, layer_meta, feat_ind, n_pts=N_PTS, ls=LS))
    decoded = jax.block_until_ready(fwd(nodes))

    assert decoded.shape == (B, 1), decoded.shape
    assert decoded.dtype == jnp.float32
    assert bool(jnp.all(jnp.isfinite(decoded)))
    # output graph glue: [replace_graph(graph, {'nodes': decoded})]
    output_graph = [{"nodes": decoded}]
    print("KERNEL_OK")
</pallas_src>

<mosaic_0001>
module attributes {stable_mosaic.version = 11 : i64} {
  func.func @_fused_pointnet_kernel(%arg0: memref<16x3xf32, #tpu.memory_space<vmem>>, %arg1: memref<528x256xbf16, #tpu.memory_space<vmem>>, %arg2: memref<18x256xf32, #tpu.memory_space<vmem>>, %arg3: memref<2x1xf32, #tpu.memory_space<vmem>>, %arg4: memref<32x16xf32, #tpu.memory_space<vmem>>) attributes {dimension_semantics = [], scalar_prefetch = 0 : i64, scratch_operands = 1 : i64, tpu.core_type = #tpu.core_type<tc>} {
    %c0 = arith.constant 0 : index
    %c0_0 = arith.constant 0 : index
    %0 = vector.load %arg0[%c0, %c0_0] : memref<16x3xf32, #tpu.memory_space<vmem>>, vector<16x3xf32>
    %c0_1 = arith.constant 0 : index
    %c0_2 = arith.constant 0 : index
    %1 = vector.load %arg1[%c0_1, %c0_2] : memref<528x256xbf16, #tpu.memory_space<vmem>>, vector<3x16xbf16>
    %2 = arith.extf %1 : vector<3x16xbf16> to vector<3x16xf32>
    %3 = vector.extract_strided_slice %0 {offsets = [0, 0], sizes = [16, 1], strides = [1, 1]} : vector<16x3xf32> to vector<16x1xf32>
    %4 = vector.extract_strided_slice %2 {offsets = [0, 0], sizes = [1, 16], strides = [1, 1]} : vector<3x16xf32> to vector<1x16xf32>
    %5 = vector.broadcast %3 : vector<16x1xf32> to vector<16x16xf32>
    %6 = vector.broadcast %4 : vector<1x16xf32> to vector<16x16xf32>
    %7 = arith.mulf %5, %6 : vector<16x16xf32>
    %8 = vector.extract_strided_slice %0 {offsets = [0, 1], sizes = [16, 1], strides = [1, 1]} : vector<16x3xf32> to vector<16x1xf32>
    %9 = vector.extract_strided_slice %2 {offsets = [1, 0], sizes = [1, 16], strides = [1, 1]} : vector<3x16xf32> to vector<1x16xf32>
    %10 = vector.broadcast %8 : vector<16x1xf32> to vector<16x16xf32>
    %11 = vector.broadcast %9 : vector<1x16xf32> to vector<16x16xf32>
    %12 = arith.mulf %10, %11 : vector<16x16xf32>
    %13 = arith.addf %7, %12 : vector<16x16xf32>
    %14 = vector.extract_strided_slice %0 {offsets = [0, 2], sizes = [16, 1], strides = [1, 1]} : vector<16x3xf32> to vector<16x1xf32>
    %15 = vector.extract_strided_slice %2 {offsets = [2, 0], sizes = [1, 16], strides = [1, 1]} : vector<3x16xf32> to vector<1x16xf32>
    %16 = vector.broadcast %14 : vector<16x1xf32> to vector<16x16xf32>
    %17 = vector.broadcast %15 : vector<1x16xf32> to vector<16x16xf32>
    %18 = arith.mulf %16, %17 : vector<16x16xf32>
    %19 = arith.addf %13, %18 : vector<16x16xf32>
    %c0_3 = arith.constant 0 : index
    %c0_4 = arith.constant 0 : index
    %20 = vector.load %arg2[%c0_3, %c0_4] : memref<18x256xf32, #tpu.memory_space<vmem>>, vector<1x16xf32>
    %21 = vector.broadcast %20 : vector<1x16xf32> to vector<16x16xf32>
    %22 = arith.addf %19, %21 : vector<16x16xf32>
    %cst = arith.constant 0.000000e+00 : f32
    %23 = vector.broadcast %cst : f32 to vector<16x16xf32>
    %24 = arith.maximumf %22, %23 : vector<16x16xf32>
    %25 = arith.truncf %24 : vector<16x16xf32> to vector<16x16xbf16>
    %c16 = arith.constant 16 : index
    %c0_5 = arith.constant 0 : index
    %26 = vector.load %arg1[%c16, %c0_5] : memref<528x256xbf16, #tpu.memory_space<vmem>>, vector<16x32xbf16>
    %cst_6 = arith.constant dense<0.000000e+00> : vector<16x32xf32>
    %27 = tpu.matmul %25, %26, %cst_6 {dimension_numbers = #tpu.dot_dimension_numbers<[1], [0], [0], [1], [0, 0, 1, 1], [], []>} : vector<16x16xbf16>, vector<16x32xbf16>, vector<16x32xf32> -> vector<16x32xf32>
    %c1 = arith.constant 1 : index
    %c0_7 = arith.constant 0 : index
    %28 = vector.load %arg2[%c1, %c0_7] : memref<18x256xf32, #tpu.memory_space<vmem>>, vector<1x32xf32>
    %29 = vector.broadcast %28 : vector<1x32xf32> to vector<16x32xf32>
    %30 = arith.addf %27, %29 : vector<16x32xf32>
    %cst_8 = arith.constant 0.000000e+00 : f32
    %31 = vector.broadcast %cst_8 : f32 to vector<16x32xf32>
    %32 = arith.maximumf %30, %31 : vector<16x32xf32>
    %33 = arith.truncf %32 : vector<16x32xf32> to vector<16x32xbf16>
    %c32 = arith.constant 32 : index
    %c0_9 = arith.constant 0 : index
    %34 = vector.load %arg1[%c32, %c0_9] : memref<528x256xbf16, #tpu.memory_space<vmem>>, vector<32x64xbf16>
    %cst_10 = arith.constant dense<0.000000e+00> : vector<16x64xf32>
    %35 = tpu.matmul %33, %34, %cst_10 {dimension_numbers = #tpu.dot_dimension_numbers<[1], [0], [0], [1], [0, 0, 1, 1], [], []>} : vector<16x32xbf16>, vector<32x64xbf16>, vector<16x64xf32> -> vector<16x64xf32>
    %c2 = arith.constant 2 : index
    %c0_11 = arith.constant 0 : index
    %36 = vector.load %arg2[%c2, %c0_11] : memref<18x256xf32, #tpu.memory_space<vmem>>, vector<1x64xf32>
    %37 = vector.broadcast %36 : vector<1x64xf32> to vector<16x64xf32>
    %38 = arith.addf %35, %37 : vector<16x64xf32>
    %cst_12 = arith.constant 0.000000e+00 : f32
    %39 = vector.broadcast %cst_12 : f32 to vector<16x64xf32>
    %40 = arith.maximumf %38, %39 : vector<16x64xf32>
    %41 = vector.shape_cast %40 : vector<16x64xf32> to vector<2x8x64xf32>
    %cst_13 = arith.constant dense<0xFF800000> : vector<2x64xf32>
    %42 = vector.multi_reduction <maximumf>, %41, %cst_13 [1] : vector<2x8x64xf32> to vector<2x64xf32>
    %43 = arith.truncf %42 : vector<2x64xf32> to vector<2x64xbf16>
    %c64 = arith.constant 64 : index
    %c0_14 = arith.constant 0 : index
    %44 = vector.load %arg1[%c64, %c0_14] : memref<528x256xbf16, #tpu.memory_space<vmem>>, vector<64x32xbf16>
    %cst_15 = arith.constant dense<0.000000e+00> : vector<2x32xf32>
    %45 = tpu.matmul %43, %44, %cst_15 {dimension_numbers = #tpu.dot_dimension_numbers<[1], [0], [0], [1], [0, 0, 1, 1], [], []>} : vector<2x64xbf16>, vector<64x32xbf16>, vector<2x32xf32> -> vector<2x32xf32>
    %c3 = arith.constant 3 : index
    %c0_16 = arith.constant 0 : index
    %46 = vector.load %arg2[%c3, %c0_16] : memref<18x256xf32, #tpu.memory_space<vmem>>, vector<1x32xf32>
    %47 = vector.broadcast %46 : vector<1x32xf32> to vector<2x32xf32>
    %48 = arith.addf %45, %47 : vector<2x32xf32>
    %cst_17 = arith.constant 0.000000e+00 : f32
    %49 = vector.broadcast %cst_17 : f32 to vector<2x32xf32>
    %50 = arith.maximumf %48, %49 : vector<2x32xf32>
    %51 = arith.truncf %50 : vector<2x32xf32> to vector<2x32xbf16>
    %c128 = arith.constant 128 : index
    %c0_18 = arith.constant 0 : index
    %52 = vector.load %arg1[%c128, %c0_18] : memref<528x256xbf16, #tpu.memory_space<vmem>>, vector<32x16xbf16>
    %cst_19 = arith.constant dense<0.000000e+00> : vector<2x16xf32>
    %53 = tpu.matmul %51, %52, %cst_19 {dimension_numbers = #tpu.dot_dimension_numbers<[1], [0], [0], [1], [0, 0, 1, 1], [], []>} : vector<2x32xbf16>, vector<32x16xbf16>, vector<2x16xf32> -> vector<2x16xf32>
    %c4 = arith.constant 4 : index
    %c0_20 = arith.constant 0 : index
    %54 = vector.load %arg2[%c4, %c0_20] : memref<18x256xf32, #tpu.memory_space<vmem>>, vector<1x16xf32>
    %55 = vector.broadcast %54 : vector<1x16xf32> to vector<2x16xf32>
    %56 = arith.addf %53, %55 : vector<2x16xf32>
    %cst_21 = arith.constant 0.000000e+00 : f32
    %57 = vector.broadcast %cst_21 : f32 to vector<2x16xf32>
    %58 = arith.maximumf %56, %57 : vector<2x16xf32>
    %59 = arith.truncf %58 : vector<2x16xf32> to vector<2x16xbf16>
    %c160 = arith.constant 160 : index
    %c0_22 = arith.constant 0 : index
    %60 = vector.load %arg1[%c160, %c0_22] : memref<528x256xbf16, #tpu.memory_space<vmem>>, vector<16x9xbf16>
    %cst_23 = arith.constant dense<0.000000e+00> : vector<2x9xf32>
    %61 = tpu.matmul %59, %60, %cst_23 {dimension_numbers = #tpu.dot_dimension_numbers<[1], [0], [0], [1], [0, 0, 1, 1], [], []>} : vector<2x16xbf16>, vector<16x9xbf16>, vector<2x9xf32> -> vector<2x9xf32>
    %c5 = arith.constant 5 : index
    %c0_24 = arith.constant 0 : index
    %62 = vector.load %arg2[%c5, %c0_24] : memref<18x256xf32, #tpu.memory_space<vmem>>, vector<1x9xf32>
    %63 = vector.broadcast %62 : vector<1x9xf32> to vector<2x9xf32>
    %64 = arith.addf %61, %63 : vector<2x9xf32>
    %65 = vector.extract_strided_slice %0 {offsets = [0, 0], sizes = [8, 3], strides = [1, 1]} : vector<16x3xf32> to vector<8x3xf32>
    %66 = vector.extract_strided_slice %65 {offsets = [0, 0], sizes = [8, 1], strides = [1, 1]} : vector<8x3xf32> to vector<8x1xf32>
    %67 = vector.extract_strided_slice %64 {offsets = [0, 0], sizes = [1, 3], strides = [1, 1]} : vector<2x9xf32> to vector<1x3xf32>
    %68 = vector.broadcast %66 : vector<8x1xf32> to vector<8x3xf32>
    %69 = vector.broadcast %67 : vector<1x3xf32> to vector<8x3xf32>
    %70 = arith.mulf %68, %69 : vector<8x3xf32>
    %71 = vector.extract_strided_slice %65 {offsets = [0, 1], sizes = [8, 1], strides = [1, 1]} : vector<8x3xf32> to vector<8x1xf32>
    %72 = vector.extract_strided_slice %64 {offsets = [0, 3], sizes = [1, 3], strides = [1, 1]} : vector<2x9xf32> to vector<1x3xf32>
    %73 = vector.broadcast %71 : vector<8x1xf32> to vector<8x3xf32>
    %74 = vector.broadcast %72 : vector<1x3xf32> to vector<8x3xf32>
    %75 = arith.mulf %73, %74 : vector<8x3xf32>
    %76 = arith.addf %70, %75 : vector<8x3xf32>
    %77 = vector.extract_strided_slice %65 {offsets = [0, 2], sizes = [8, 1], strides = [1, 1]} : vector<8x3xf32> to vector<8x1xf32>
    %78 = vector.extract_strided_slice %64 {offsets = [0, 6], sizes = [1, 3], strides = [1, 1]} : vector<2x9xf32> to vector<1x3xf32>
    %79 = vector.broadcast %77 : vector<8x1xf32> to vector<8x3xf32>
    %80 = vector.broadcast %78 : vector<1x3xf32> to vector<8x3xf32>
    %81 = arith.mulf %79, %80 : vector<8x3xf32>
    %82 = arith.addf %76, %81 : vector<8x3xf32>
    %83 = vector.extract_strided_slice %0 {offsets = [8, 0], sizes = [8, 3], strides = [1, 1]} : vector<16x3xf32> to vector<8x3xf32>
    %84 = vector.extract_strided_slice %83 {offsets = [0, 0], sizes = [8, 1], strides = [1, 1]} : vector<8x3xf32> to vector<8x1xf32>
    %85 = vector.extract_strided_slice %64 {offsets = [1, 0], sizes = [1, 3], strides = [1, 1]} : vector<2x9xf32> to vector<1x3xf32>
    %86 = vector.broadcast %84 : vector<8x1xf32> to vector<8x3xf32>
    %87 = vector.broadcast %85 : vector<1x3xf32> to vector<8x3xf32>
    %88 = arith.mulf %86, %87 : vector<8x3xf32>
    %89 = vector.extract_strided_slice %83 {offsets = [0, 1], sizes = [8, 1], strides = [1, 1]} : vector<8x3xf32> to vector<8x1xf32>
    %90 = vector.extract_strided_slice %64 {offsets = [1, 3], sizes = [1, 3], strides = [1, 1]} : vector<2x9xf32> to vector<1x3xf32>
    %91 = vector.broadcast %89 : vector<8x1xf32> to vector<8x3xf32>
    %92 = vector.broadcast %90 : vector<1x3xf32> to vector<8x3xf32>
    %93 = arith.mulf %91, %92 : vector<8x3xf32>
    %94 = arith.addf %88, %93 : vector<8x3xf32>
    %95 = vector.extract_strided_slice %83 {offsets = [0, 2], sizes = [8, 1], strides = [1, 1]} : vector<8x3xf32> to vector<8x1xf32>
    %96 = vector.extract_strided_slice %64 {offsets = [1, 6], sizes = [1, 3], strides = [1, 1]} : vector<2x9xf32> to vector<1x3xf32>
    %97 = vector.broadcast %95 : vector<8x1xf32> to vector<8x3xf32>
    %98 = vector.broadcast %96 : vector<1x3xf32> to vector<8x3xf32>
    %99 = arith.mulf %97, %98 : vector<8x3xf32>
    %100 = arith.addf %94, %99 : vector<8x3xf32>
    %101 = tpu.concatenate %82, %100 in 0 : vector<8x3xf32>, vector<8x3xf32> -> vector<16x3xf32>
    %c352 = arith.constant 352 : index
    %c0_25 = arith.constant 0 : index
    %102 = vector.load %arg1[%c352, %c0_25] : memref<528x256xbf16, #tpu.memory_space<vmem>>, vector<3x16xbf16>
    %103 = arith.extf %102 : vector<3x16xbf16> to vector<3x16xf32>
    %104 = vector.extract_strided_slice %101 {offsets = [0, 0], sizes = [16, 1], strides = [1, 1]} : vector<16x3xf32> to vector<16x1xf32>
    %105 = vector.extract_strided_slice %103 {offsets = [0, 0], sizes = [1, 16], strides = [1, 1]} : vector<3x16xf32> to vector<1x16xf32>
    %106 = vector.broadcast %104 : vector<16x1xf32> to vector<16x16xf32>
    %107 = vector.broadcast %105 : vector<1x16xf32> to vector<16x16xf32>
    %108 = arith.mulf %106, %107 : vector<16x16xf32>
    %109 = vector.extract_strided_slice %101 {offsets = [0, 1], sizes = [16, 1], strides = [1, 1]} : vector<16x3xf32> to vector<16x1xf32>
    %110 = vector.extract_strided_slice %103 {offsets = [1, 0], sizes = [1, 16], strides = [1, 1]} : vector<3x16xf32> to vector<1x16xf32>
    %111 = vector.broadcast %109 : vector<16x1xf32> to vector<16x16xf32>
    %112 = vector.broadcast %110 : vector<1x16xf32> to vector<16x16xf32>
    %113 = arith.mulf %111, %112 : vector<16x16xf32>
    %114 = arith.addf %108, %113 : vector<16x16xf32>
    %115 = vector.extract_strided_slice %101 {offsets = [0, 2], sizes = [16, 1], strides = [1, 1]} : vector<16x3xf32> to vector<16x1xf32>
    %116 = vector.extract_strided_slice %103 {offsets = [2, 0], sizes = [1, 16], strides = [1, 1]} : vector<3x16xf32> to vector<1x16xf32>
    %117 = vector.broadcast %115 : vector<16x1xf32> to vector<16x16xf32>
    %118 = vector.broadcast %116 : vector<1x16xf32> to vector<16x16xf32>
    %119 = arith.mulf %117, %118 : vector<16x16xf32>
    %120 = arith.addf %114, %119 : vector<16x16xf32>
    %c12 = arith.constant 12 : index
    %c0_26 = arith.constant 0 : index
    %121 = vector.load %arg2[%c12, %c0_26] : memref<18x256xf32, #tpu.memory_space<vmem>>, vector<1x16xf32>
    %122 = vector.broadcast %121 : vector<1x16xf32> to vector<16x16xf32>
    %123 = arith.addf %120, %122 : vector<16x16xf32>
    %cst_27 = arith.constant 0.000000e+00 : f32
    %124 = vector.broadcast %cst_27 : f32 to vector<16x16xf32>
    %125 = arith.maximumf %123, %124 : vector<16x16xf32>
    %126 = arith.truncf %125 : vector<16x16xf32> to vector<16x16xbf16>
    %c176 = arith.constant 176 : index
    %c0_28 = arith.constant 0 : index
    %127 = vector.load %arg1[%c176, %c0_28] : memref<528x256xbf16, #tpu.memory_space<vmem>>, vector<16x16xbf16>
    %cst_29 = arith.constant dense<0.000000e+00> : vector<16x16xf32>
    %128 = tpu.matmul %126, %127, %cst_29 {dimension_numbers = #tpu.dot_dimension_numbers<[1], [0], [0], [1], [0, 0, 1, 1], [], []>} : vector<16x16xbf16>, vector<16x16xbf16>, vector<16x16xf32> -> vector<16x16xf32>
    %c6 = arith.constant 6 : index
    %c0_30 = arith.constant 0 : index
    %129 = vector.load %arg2[%c6, %c0_30] : memref<18x256xf32, #tpu.memory_space<vmem>>, vector<1x16xf32>
    %130 = vector.broadcast %129 : vector<1x16xf32> to vector<16x16xf32>
    %131 = arith.addf %128, %130 : vector<16x16xf32>
    %cst_31 = arith.constant 0.000000e+00 : f32
    %132 = vector.broadcast %cst_31 : f32 to vector<16x16xf32>
    %133 = arith.maximumf %131, %132 : vector<16x16xf32>
    %134 = arith.truncf %133 : vector<16x16xf32> to vector<16x16xbf16>
    %c192 = arith.constant 192 : index
    %c0_32 = arith.constant 0 : index
    %135 = vector.load %arg1[%c192, %c0_32] : memref<528x256xbf16, #tpu.memory_space<vmem>>, vector<16x32xbf16>
    %cst_33 = arith.constant dense<0.000000e+00> : vector<16x32xf32>
    %136 = tpu.matmul %134, %135, %cst_33 {dimension_numbers = #tpu.dot_dimension_numbers<[1], [0], [0], [1], [0, 0, 1, 1], [], []>} : vector<16x16xbf16>, vector<16x32xbf16>, vector<16x32xf32> -> vector<16x32xf32>
    %c7 = arith.constant 7 : index
    %c0_34 = arith.constant 0 : index
    %137 = vector.load %arg2[%c7, %c0_34] : memref<18x256xf32, #tpu.memory_space<vmem>>, vector<1x32xf32>
    %138 = vector.broadcast %137 : vector<1x32xf32> to vector<16x32xf32>
    %139 = arith.addf %136, %138 : vector<16x32xf32>
    %cst_35 = arith.constant 0.000000e+00 : f32
    %140 = vector.broadcast %cst_35 : f32 to vector<16x32xf32>
    %141 = arith.maximumf %139, %140 : vector<16x32xf32>
    %142 = arith.truncf %141 : vector<16x32xf32> to vector<16x32xbf16>
    %c208 = arith.constant 208 : index
    %c0_36 = arith.constant 0 : index
    %143 = vector.load %arg1[%c208, %c0_36] : memref<528x256xbf16, #tpu.memory_space<vmem>>, vector<32x64xbf16>
    %cst_37 = arith.constant dense<0.000000e+00> : vector<16x64xf32>
    %144 = tpu.matmul %142, %143, %cst_37 {dimension_numbers = #tpu.dot_dimension_numbers<[1], [0], [0], [1], [0, 0, 1, 1], [], []>} : vector<16x32xbf16>, vector<32x64xbf16>, vector<16x64xf32> -> vector<16x64xf32>
    %c8 = arith.constant 8 : index
    %c0_38 = arith.constant 0 : index
    %145 = vector.load %arg2[%c8, %c0_38] : memref<18x256xf32, #tpu.memory_space<vmem>>, vector<1x64xf32>
    %146 = vector.broadcast %145 : vector<1x64xf32> to vector<16x64xf32>
    %147 = arith.addf %144, %146 : vector<16x64xf32>
    %cst_39 = arith.constant 0.000000e+00 : f32
    %148 = vector.broadcast %cst_39 : f32 to vector<16x64xf32>
    %149 = arith.maximumf %147, %148 : vector<16x64xf32>
    %150 = vector.shape_cast %149 : vector<16x64xf32> to vector<2x8x64xf32>
    %cst_40 = arith.constant dense<0xFF800000> : vector<2x64xf32>
    %151 = vector.multi_reduction <maximumf>, %150, %cst_40 [1] : vector<2x8x64xf32> to vector<2x64xf32>
    %152 = arith.truncf %151 : vector<2x64xf32> to vector<2x64xbf16>
    %c240 = arith.constant 240 : index
    %c0_41 = arith.constant 0 : index
    %153 = vector.load %arg1[%c240, %c0_41] : memref<528x256xbf16, #tpu.memory_space<vmem>>, vector<64x32xbf16>
    %cst_42 = arith.constant dense<0.000000e+00> : vector<2x32xf32>
    %154 = tpu.matmul %152, %153, %cst_42 {dimension_numbers = #tpu.dot_dimension_numbers<[1], [0], [0], [1], [0, 0, 1, 1], [], []>} : vector<2x64xbf16>, vector<64x32xbf16>, vector<2x32xf32> -> vector<2x32xf32>
    %c9 = arith.constant 9 : index
    %c0_43 = arith.constant 0 : index
    %155 = vector.load %arg2[%c9, %c0_43] : memref<18x256xf32, #tpu.memory_space<vmem>>, vector<1x32xf32>
    %156 = vector.broadcast %155 : vector<1x32xf32> to vector<2x32xf32>
    %157 = arith.addf %154, %156 : vector<2x32xf32>
    %cst_44 = arith.constant 0.000000e+00 : f32
    %158 = vector.broadcast %cst_44 : f32 to vector<2x32xf32>
    %159 = arith.maximumf %157, %158 : vector<2x32xf32>
    %160 = arith.truncf %159 : vector<2x32xf32> to vector<2x32xbf16>
    %c304 = arith.constant 304 : index
    %c0_45 = arith.constant 0 : index
    %161 = vector.load %arg1[%c304, %c0_45] : memref<528x256xbf16, #tpu.memory_space<vmem>>, vector<32x16xbf16>
    %cst_46 = arith.constant dense<0.000000e+00> : vector<2x16xf32>
    %162 = tpu.matmul %160, %161, %cst_46 {dimension_numbers = #tpu.dot_dimension_numbers<[1], [0], [0], [1], [0, 0, 1, 1], [], []>} : vector<2x32xbf16>, vector<32x16xbf16>, vector<2x16xf32> -> vector<2x16xf32>
    %c10 = arith.constant 10 : index
    %c0_47 = arith.constant 0 : index
    %163 = vector.load %arg2[%c10, %c0_47] : memref<18x256xf32, #tpu.memory_space<vmem>>, vector<1x16xf32>
    %164 = vector.broadcast %163 : vector<1x16xf32> to vector<2x16xf32>
    %165 = arith.addf %162, %164 : vector<2x16xf32>
    %cst_48 = arith.constant 0.000000e+00 : f32
    %166 = vector.broadcast %cst_48 : f32 to vector<2x16xf32>
    %167 = arith.maximumf %165, %166 : vector<2x16xf32>
    %168 = arith.truncf %167 : vector<2x16xf32> to vector<2x16xbf16>
    %c336 = arith.constant 336 : index
    %c0_49 = arith.constant 0 : index
    %169 = vector.load %arg1[%c336, %c0_49] : memref<528x256xbf16, #tpu.memory_space<vmem>>, vector<16x256xbf16>
    %cst_50 = arith.constant dense<0.000000e+00> : vector<2x256xf32>
    %170 = tpu.matmul %168, %169, %cst_50 {dimension_numbers = #tpu.dot_dimension_numbers<[1], [0], [0], [1], [0, 0, 1, 1], [], []>} : vector<2x16xbf16>, vector<16x256xbf16>, vector<2x256xf32> -> vector<2x256xf32>
    %c11 = arith.constant 11 : index
    %c0_51 = arith.constant 0 : index
    %171 = vector.load %arg2[%c11, %c0_51] : memref<18x256xf32, #tpu.memory_space<vmem>>, vector<1x256xf32>
    %172 = vector.broadcast %171 : vector<1x256xf32> to vector<2x256xf32>
    %173 = arith.addf %170, %172 : vector<2x256xf32>
    %174 = vector.extract_strided_slice %173 {offsets = [0, 0], sizes = [2, 16], strides = [1, 1]} : vector<2x256xf32> to vector<2x16xf32>
    %c0_52 = arith.constant 0 : index
    %c0_53 = arith.constant 0 : index
    %175 = vector.load %arg4[%c0_52, %c0_53] : memref<32x16xf32, #tpu.memory_space<vmem>>, vector<2x16xf32>
    tpu.vector_store %arg4[%c0_52, %c0_53], %174 {strides = array<i32>} : memref<32x16xf32, #tpu.memory_space<vmem>>, vector<2x16xf32>,
    %176 = vector.extract_strided_slice %173 {offsets = [0, 16], sizes = [2, 16], strides = [1, 1]} : vector<2x256xf32> to vector<2x16xf32>
    %c2_54 = arith.constant 2 : index
    %c0_55 = arith.constant 0 : index
    %177 = vector.load %arg4[%c2_54, %c0_55] : memref<32x16xf32, #tpu.memory_space<vmem>>, vector<2x16xf32>
    tpu.vector_store %arg4[%c2_54, %c0_55], %176 {strides = array<i32>} : memref<32x16xf32, #tpu.memory_space<vmem>>, vector<2x16xf32>,
    %178 = vector.extract_strided_slice %173 {offsets = [0, 32], sizes = [2, 16], strides = [1, 1]} : vector<2x256xf32> to vector<2x16xf32>
    %c4_56 = arith.constant 4 : index
    %c0_57 = arith.constant 0 : index
    %179 = vector.load %arg4[%c4_56, %c0_57] : memref<32x16xf32, #tpu.memory_space<vmem>>, vector<2x16xf32>
    tpu.vector_store %arg4[%c4_56, %c0_57], %178 {strides = array<i32>} : memref<32x16xf32, #tpu.memory_space<vmem>>, vector<2x16xf32>,
    %180 = vector.extract_strided_slice %173 {offsets = [0, 48], sizes = [2, 16], strides = [1, 1]} : vector<2x256xf32> to vector<2x16xf32>
    %c6_58 = arith.constant 6 : index
    %c0_59 = arith.constant 0 : index
    %181 = vector.load %arg4[%c6_58, %c0_59] : memref<32x16xf32, #tpu.memory_space<vmem>>, vector<2x16xf32>
    tpu.vector_store %arg4[%c6_58, %c0_59], %180 {strides = array<i32>} : memref<32x16xf32, #tpu.memory_space<vmem>>, vector<2x16xf32>,
    %182 = vector.extract_strided_slice %173 {offsets = [0, 64], sizes = [2, 16], strides = [1, 1]} : vector<2x256xf32> to vector<2x16xf32>
    %c8_60 = arith.constant 8 : index
    %c0_61 = arith.constant 0 : index
    %183 = vector.load %arg4[%c8_60, %c0_61] : memref<32x16xf32, #tpu.memory_space<vmem>>, vector<2x16xf32>
    tpu.vector_store %arg4[%c8_60, %c0_61], %182 {strides = array<i32>} : memref<32x16xf32, #tpu.memory_space<vmem>>, vector<2x16xf32>,
    %184 = vector.extract_strided_slice %173 {offsets = [0, 80], sizes = [2, 16], strides = [1, 1]} : vector<2x256xf32> to vector<2x16xf32>
    %c10_62 = arith.constant 10 : index
    %c0_63 = arith.constant 0 : index
    %185 = vector.load %arg4[%c10_62, %c0_63] : memref<32x16xf32, #tpu.memory_space<vmem>>, vector<2x16xf32>
    tpu.vector_store %arg4[%c10_62, %c0_63], %184 {strides = array<i32>} : memref<32x16xf32, #tpu.memory_space<vmem>>, vector<2x16xf32>,
    %186 = vector.extract_strided_slice %173 {offsets = [0, 96], sizes = [2, 16], strides = [1, 1]} : vector<2x256xf32> to vector<2x16xf32>
    %c12_64 = arith.constant 12 : index
    %c0_65 = arith.constant 0 : index
    %187 = vector.load %arg4[%c12_64, %c0_65] : memref<32x16xf32, #tpu.memory_space<vmem>>, vector<2x16xf32>
    tpu.vector_store %arg4[%c12_64, %c0_65], %186 {strides = array<i32>} : memref<32x16xf32, #tpu.memory_space<vmem>>, vector<2x16xf32>,
    %188 = vector.extract_strided_slice %173 {offsets = [0, 112], sizes = [2, 16], strides = [1, 1]} : vector<2x256xf32> to vector<2x16xf32>
    %c14 = arith.constant 14 : index
    %c0_66 = arith.constant 0 : index
    %189 = vector.load %arg4[%c14, %c0_66] : memref<32x16xf32, #tpu.memory_space<vmem>>, vector<2x16xf32>
    tpu.vector_store %arg4[%c14, %c0_66], %188 {strides = array<i32>} : memref<32x16xf32, #tpu.memory_space<vmem>>, vector<2x16xf32>,
    %190 = vector.extract_strided_slice %173 {offsets = [0, 128], sizes = [2, 16], strides = [1, 1]} : vector<2x256xf32> to vector<2x16xf32>
    %c16_67 = arith.constant 16 : index
    %c0_68 = arith.constant 0 : index
    %191 = vector.load %arg4[%c16_67, %c0_68] : memref<32x16xf32, #tpu.memory_space<vmem>>, vector<2x16xf32>
    tpu.vector_store %arg4[%c16_67, %c0_68], %190 {strides = array<i32>} : memref<32x16xf32, #tpu.memory_space<vmem>>, vector<2x16xf32>,
    %192 = vector.extract_strided_slice %173 {offsets = [0, 144], sizes = [2, 16], strides = [1, 1]} : vector<2x256xf32> to vector<2x16xf32>
    %c18 = arith.constant 18 : index
    %c0_69 = arith.constant 0 : index
    %193 = vector.load %arg4[%c18, %c0_69] : memref<32x16xf32, #tpu.memory_space<vmem>>, vector<2x16xf32>
    tpu.vector_store %arg4[%c18, %c0_69], %192 {strides = array<i32>} : memref<32x16xf32, #tpu.memory_space<vmem>>, vector<2x16xf32>,
    %194 = vector.extract_strided_slice %173 {offsets = [0, 160], sizes = [2, 16], strides = [1, 1]} : vector<2x256xf32> to vector<2x16xf32>
    %c20 = arith.constant 20 : index
    %c0_70 = arith.constant 0 : index
    %195 = vector.load %arg4[%c20, %c0_70] : memref<32x16xf32, #tpu.memory_space<vmem>>, vector<2x16xf32>
    tpu.vector_store %arg4[%c20, %c0_70], %194 {strides = array<i32>} : memref<32x16xf32, #tpu.memory_space<vmem>>, vector<2x16xf32>,
    %196 = vector.extract_strided_slice %173 {offsets = [0, 176], sizes = [2, 16], strides = [1, 1]} : vector<2x256xf32> to vector<2x16xf32>
    %c22 = arith.constant 22 : index
    %c0_71 = arith.constant 0 : index
    %197 = vector.load %arg4[%c22, %c0_71] : memref<32x16xf32, #tpu.memory_space<vmem>>, vector<2x16xf32>
    tpu.vector_store %arg4[%c22, %c0_71], %196 {strides = array<i32>} : memref<32x16xf32, #tpu.memory_space<vmem>>, vector<2x16xf32>,
    %198 = vector.extract_strided_slice %173 {offsets = [0, 192], sizes = [2, 16], strides = [1, 1]} : vector<2x256xf32> to vector<2x16xf32>
    %c24 = arith.constant 24 : index
    %c0_72 = arith.constant 0 : index
    %199 = vector.load %arg4[%c24, %c0_72] : memref<32x16xf32, #tpu.memory_space<vmem>>, vector<2x16xf32>
    tpu.vector_store %arg4[%c24, %c0_72], %198 {strides = array<i32>} : memref<32x16xf32, #tpu.memory_space<vmem>>, vector<2x16xf32>,
    %200 = vector.extract_strided_slice %173 {offsets = [0, 208], sizes = [2, 16], strides = [1, 1]} : vector<2x256xf32> to vector<2x16xf32>
    %c26 = arith.constant 26 : index
    %c0_73 = arith.constant 0 : index
    %201 = vector.load %arg4[%c26, %c0_73] : memref<32x16xf32, #tpu.memory_space<vmem>>, vector<2x16xf32>
    tpu.vector_store %arg4[%c26, %c0_73], %200 {strides = array<i32>} : memref<32x16xf32, #tpu.memory_space<vmem>>, vector<2x16xf32>,
    %202 = vector.extract_strided_slice %173 {offsets = [0, 224], sizes = [2, 16], strides = [1, 1]} : vector<2x256xf32> to vector<2x16xf32>
    %c28 = arith.constant 28 : index
    %c0_74 = arith.constant 0 : index
    %203 = vector.load %arg4[%c28, %c0_74] : memref<32x16xf32, #tpu.memory_space<vmem>>, vector<2x16xf32>
    tpu.vector_store %arg4[%c28, %c0_74], %202 {strides = array<i32>} : memref<32x16xf32, #tpu.memory_space<vmem>>, vector<2x16xf32>,
    %204 = vector.extract_strided_slice %173 {offsets = [0, 240], sizes = [2, 16], strides = [1, 1]} : vector<2x256xf32> to vector<2x16xf32>
    %c30 = arith.constant 30 : index
    %c0_75 = arith.constant 0 : index
    %205 = vector.load %arg4[%c30, %c0_75] : memref<32x16xf32, #tpu.memory_space<vmem>>, vector<2x16xf32>
    tpu.vector_store %arg4[%c30, %c0_75], %204 {strides = array<i32>} : memref<32x16xf32, #tpu.memory_space<vmem>>, vector<2x16xf32>,
    %206 = vector.extract_strided_slice %125 {offsets = [0, 0], sizes = [8, 16], strides = [1, 1]} : vector<16x16xf32> to vector<8x16xf32>
    %c0_76 = arith.constant 0 : index
    %c0_77 = arith.constant 0 : index
    %207 = tpu.strided_load %arg4[%c0_76, %c0_77] {strides = array<i32: 2, 1>} : memref<32x16xf32, #tpu.memory_space<vmem>>, vector<16x16xf32>
    %cst_78 = arith.constant dense<0.000000e+00> : vector<8x16xf32>
    %208 = tpu.matmul %206, %207, %cst_78 {dimension_numbers = #tpu.dot_dimension_numbers<[1], [0], [0], [1], [0, 0, 1, 1], [], []>} : vector<8x16xf32>, vector<16x16xf32>, vector<8x16xf32> -> vector<8x16xf32>
    %209 = vector.extract_strided_slice %125 {offsets = [8, 0], sizes = [8, 16], strides = [1, 1]} : vector<16x16xf32> to vector<8x16xf32>
    %c1_79 = arith.constant 1 : index
    %c0_80 = arith.constant 0 : index
    %210 = tpu.strided_load %arg4[%c1_79, %c0_80] {strides = array<i32: 2, 1>} : memref<32x16xf32, #tpu.memory_space<vmem>>, vector<16x16xf32>
    %cst_81 = arith.constant dense<0.000000e+00> : vector<8x16xf32>
    %211 = tpu.matmul %209, %210, %cst_81 {dimension_numbers = #tpu.dot_dimension_numbers<[1], [0], [0], [1], [0, 0, 1, 1], [], []>} : vector<8x16xf32>, vector<16x16xf32>, vector<8x16xf32> -> vector<8x16xf32>
    %212 = tpu.concatenate %208, %211 in 0 : vector<8x16xf32>, vector<8x16xf32> -> vector<16x16xf32>
    %213 = arith.truncf %212 : vector<16x16xf32> to vector<16x16xbf16>
    %c368 = arith.constant 368 : index
    %c0_82 = arith.constant 0 : index
    %214 = vector.load %arg1[%c368, %c0_82] : memref<528x256xbf16, #tpu.memory_space<vmem>>, vector<16x32xbf16>
    %cst_83 = arith.constant dense<0.000000e+00> : vector<16x32xf32>
    %215 = tpu.matmul %213, %214, %cst_83 {dimension_numbers = #tpu.dot_dimension_numbers<[1], [0], [0], [1], [0, 0, 1, 1], [], []>} : vector<16x16xbf16>, vector<16x32xbf16>, vector<16x32xf32> -> vector<16x32xf32>
    %c13 = arith.constant 13 : index
    %c0_84 = arith.constant 0 : index
    %216 = vector.load %arg2[%c13, %c0_84] : memref<18x256xf32, #tpu.memory_space<vmem>>, vector<1x32xf32>
    %217 = vector.broadcast %216 : vector<1x32xf32> to vector<16x32xf32>
    %218 = arith.addf %215, %217 : vector<16x32xf32>
    %cst_85 = arith.constant 0.000000e+00 : f32
    %219 = vector.broadcast %cst_85 : f32 to vector<16x32xf32>
    %220 = arith.maximumf %218, %219 : vector<16x32xf32>
    %221 = arith.truncf %220 : vector<16x32xf32> to vector<16x32xbf16>
    %c384 = arith.constant 384 : index
    %c0_86 = arith.constant 0 : index
    %222 = vector.load %arg1[%c384, %c0_86] : memref<528x256xbf16, #tpu.memory_space<vmem>>, vector<32x64xbf16>
    %cst_87 = arith.constant dense<0.000000e+00> : vector<16x64xf32>
    %223 = tpu.matmul %221, %222, %cst_87 {dimension_numbers = #tpu.dot_dimension_numbers<[1], [0], [0], [1], [0, 0, 1, 1], [], []>} : vector<16x32xbf16>, vector<32x64xbf16>, vector<16x64xf32> -> vector<16x64xf32>
    %c14_88 = arith.constant 14 : index
    %c0_89 = arith.constant 0 : index
    %224 = vector.load %arg2[%c14_88, %c0_89] : memref<18x256xf32, #tpu.memory_space<vmem>>, vector<1x64xf32>
    %225 = vector.broadcast %224 : vector<1x64xf32> to vector<16x64xf32>
    %226 = arith.addf %223, %225 : vector<16x64xf32>
    %227 = vector.shape_cast %226 : vector<16x64xf32> to vector<2x8x64xf32>
    %cst_90 = arith.constant dense<0xFF800000> : vector<2x64xf32>
    %228 = vector.multi_reduction <maximumf>, %227, %cst_90 [1] : vector<2x8x64xf32> to vector<2x64xf32>
    %229 = arith.truncf %228 : vector<2x64xf32> to vector<2x64xbf16>
    %c416 = arith.constant 416 : index
    %c0_91 = arith.constant 0 : index
    %230 = vector.load %arg1[%c416, %c0_91] : memref<528x256xbf16, #tpu.memory_space<vmem>>, vector<64x32xbf16>
    %cst_92 = arith.constant dense<0.000000e+00> : vector<2x32xf32>
    %231 = tpu.matmul %229, %230, %cst_92 {dimension_numbers = #tpu.dot_dimension_numbers<[1], [0], [0], [1], [0, 0, 1, 1], [], []>} : vector<2x64xbf16>, vector<64x32xbf16>, vector<2x32xf32> -> vector<2x32xf32>
    %c15 = arith.constant 15 : index
    %c0_93 = arith.constant 0 : index
    %232 = vector.load %arg2[%c15, %c0_93] : memref<18x256xf32, #tpu.memory_space<vmem>>, vector<1x32xf32>
    %233 = vector.broadcast %232 : vector<1x32xf32> to vector<2x32xf32>
    %234 = arith.addf %231, %233 : vector<2x32xf32>
    %cst_94 = arith.constant 0.000000e+00 : f32
    %235 = vector.broadcast %cst_94 : f32 to vector<2x32xf32>
    %236 = arith.maximumf %234, %235 : vector<2x32xf32>
    %237 = arith.truncf %236 : vector<2x32xf32> to vector<2x32xbf16>
    %c480 = arith.constant 480 : index
    %c0_95 = arith.constant 0 : index
    %238 = vector.load %arg1[%c480, %c0_95] : memref<528x256xbf16, #tpu.memory_space<vmem>>, vector<32x16xbf16>
    %cst_96 = arith.constant dense<0.000000e+00> : vector<2x16xf32>
    %239 = tpu.matmul %237, %238, %cst_96 {dimension_numbers = #tpu.dot_dimension_numbers<[1], [0], [0], [1], [0, 0, 1, 1], [], []>} : vector<2x32xbf16>, vector<32x16xbf16>, vector<2x16xf32> -> vector<2x16xf32>
    %c16_97 = arith.constant 16 : index
    %c0_98 = arith.constant 0 : index
    %240 = vector.load %arg2[%c16_97, %c0_98] : memref<18x256xf32, #tpu.memory_space<vmem>>, vector<1x16xf32>
    %241 = vector.broadcast %240 : vector<1x16xf32> to vector<2x16xf32>
    %242 = arith.addf %239, %241 : vector<2x16xf32>
    %cst_99 = arith.constant 0.000000e+00 : f32
    %243 = vector.broadcast %cst_99 : f32 to vector<2x16xf32>
    %244 = arith.maximumf %242, %243 : vector<2x16xf32>
    %245 = arith.truncf %244 : vector<2x16xf32> to vector<2x16xbf16>
    %c512 = arith.constant 512 : index
    %c0_100 = arith.constant 0 : index
    %246 = vector.load %arg1[%c512, %c0_100] : memref<528x256xbf16, #tpu.memory_space<vmem>>, vector<16x1xbf16>
    %cst_101 = arith.constant dense<0.000000e+00> : vector<2x1xf32>
    %247 = tpu.matmul %245, %246, %cst_101 {dimension_numbers = #tpu.dot_dimension_numbers<[1], [0], [0], [1], [0, 0, 1, 1], [], []>} : vector<2x16xbf16>, vector<16x1xbf16>, vector<2x1xf32> -> vector<2x1xf32>
    %c17 = arith.constant 17 : index
    %c0_102 = arith.constant 0 : index
    %248 = vector.load %arg2[%c17, %c0_102] : memref<18x256xf32, #tpu.memory_space<vmem>>, vector<1x1xf32>
    %249 = vector.broadcast %248 : vector<1x1xf32> to vector<2x1xf32>
    %250 = arith.addf %247, %249 : vector<2x1xf32>
    %c0_103 = arith.constant 0 : index
    %c0_104 = arith.constant 0 : index
    %251 = vector.load %arg3[%c0_103, %c0_104] : memref<2x1xf32, #tpu.memory_space<vmem>>, vector<2x1xf32>
    tpu.vector_store %arg3[%c0_103, %c0_104], %250 {strides = array<i32>} : memref<2x1xf32, #tpu.memory_space<vmem>>, vector<2x1xf32>,
    return
  }
}

</mosaic_0001>

<bundles_post_ra>
// kernel: _lambda_.1
= control target key start
LH: loop header
LB: loop body
LE: loop exit
PB: predicated region body
PF: predicated region fallthrough
CT: control target
= control target key end

     0   :  { %v1757_v0 = vmov 1   ;;  %v1758_v1 = vmov 0   ;;  %v1759_v4 = vmov 2   ;;  %v1760_v6 = vmov 0.0   ;;  %s1762_s21 = smov 125   ;;  %s1763_s22 = smov 122   ;;  %s2133_s0 = inlined_call_operand.vmem [shape: f32[16,3], index: 0, kind: input, shape index: {}]   ;;  %s2134_s1 = inlined_call_operand.vmem [shape: bf16[528,256], index: 1, kind: input, shape index: {}]   ;;  %s2135_s2 = inlined_call_operand.vmem [shape: f32[18,256], index: 2, kind: input, shape index: {}]   ;;  %s2136_s3 = inlined_call_operand.vmem [shape: f32[2,1], index: 3, kind: output, shape index: {}]  }
   0x1   :  { %1716 = vset.pattern.permute.xlu1 %v1757_v0  ;;  %1715 = vset.pattern.permute.xlu0 %v1758_v1  ;;  %v15_v2 = vld [vmem:[%s2133_s0] sm:$0xff]  ;;  %v16_v3 = vld [vmem:[%s2133_s0 + $0x8] sm:$0xff]  ;;  %v1724_v5 = vld [vmem:[%s2134_s1 + $0x10] ss:$8 sps:$4 sm:$0xff]   ;;  %vm1761_vm0 = vmmov 0   ;;  %v29_v7 = vlaneseq  ;;  %vm82_vm1 = vcmask 130048  }
   0x2   :  { %36 = vperm.xlu1 %1716, %v15_v2   ;;  %21 = vperm.xlu0 %1715, %v15_v2   ;;  %v17_v9 = vld [vmem:[%s2134_s1] sm:$0x3]  ;;  %v1726_v40 = vld [vmem:[%s2134_s1 + $0x30] ss:$8 sps:$4 sm:$0xff]   ;;  %vm147_vm2 = vcmask 261120   ;;  %vm194_vm3 = vcmask 523264  }
   0x3   :  { %1560 = vmatprep.subr.bf16.mxu1 %v1760_v6  ;;  %1574 = vmatprep.subr.bf16.mxu0 %v1760_v6  ;;  %v1814_v8 = vshrl.u32 %v29_v7, 7  ;;  %v18_v10 = vunpack.c.l.bf16 %v17_v9  ;;  %v67_v31 = vld [vmem:[%s2135_s2] ss:$0 sm:$0xff]  ;;  %v75_v41 = vld [vmem:[%s2135_s2 + $0x1] ss:$0 sm:$0xff]  ;;  %vm224_vm4 = vcmask 1041409  }
   0x4   :  { %1561 = vmatpush3.bf16.msra.mxu1 %v1724_v5  ;;  %1562 = vmatprep.mubr.msk.bf16.mxu1 %vm1761_vm0, %v1760_v6  ;;  %v1725_v39 = vld [vmem:[%s2134_s1 + $0x20] ss:$8 sps:$4 sm:$0xff]   ;;  %v1728_v52 = vld [vmem:[%s2134_s1 + $0x50] ss:$8 sps:$4 sm:$0xff]   ;;  %vm906_vm5 = vcmask 123904   ;;  %s1764_s8 = smov 96  }
   0x5   :  { %1566 = vmatprep.subr.bf16.mxu1 %v1760_v6  ;;  %1582 = vmatprep.mubr.msk.bf16.mxu0 %vm1761_vm0, %v1760_v6  ;;  %v1820_v11 = vsub.s32 1, %v1814_v8  ;;  %v1823_v12 = vsub.s32 0, %v1814_v8  ;;  %v61_v15 = vsub.s32 2, %v1814_v8  ;;  %v1727_v51 = vld [vmem:[%s2134_s1 + $0x40] ss:$8 sps:$4 sm:$0xff]   ;;  %s1765_s9 = smov 112  }
   0x6   :  { %40 = vperm.xlu1 %1716, %v16_v3   ;;  %26 = vperm.xlu0 %1715, %v16_v3   ;;  %v1729_v53 = vld [vmem:[%s2134_s1 + $0x60] ss:$8 sps:$4 sm:$0xff]   ;;  %v1730_v54 = vld [vmem:[%s2134_s1 + $0x70] ss:$8 sps:$4 sm:$0xff]   ;;  %s1766_s10 = smov 64   ;;  %s1767_s11 = smov 80  }
   0x7   :  { %v46_v16 = vrot.slane %v18_v10, %v1820_v11  ;;  %v32_v17 = vrot.slane %v18_v10, %v1823_v12  ;;  %v62_v20 = vrot.slane %v18_v10, %v61_v15  ;;  %1575 = vmatpush3.bf16.msra.mxu0 %v1727_v51  ;;  %v134_v55 = vld [vmem:[%s2135_s2 + $0x2] ss:$0 sm:$0xff]  ;;  %s1768_s12 = smov 32   ;;  %s1769_s13 = smov 48   ;;  %vm1452_vm6 = vcmask 1024  }
   0x8   :  { %1576 = vmatprep.subr.bf16.mxu0 %v1760_v6  ;;  %s1770_s14 = smov 16  }
   0xa   :  { %1718 = vset.pattern.permute.xlu1 %v1759_v4  ;;  %1717 = vset.pattern.permute.xlu0 %v1759_v4 }
   0xb   :  { %56 = vperm.xlu1 %1718, %v16_v3   ;;  %52 = vperm.xlu0 %1717, %v15_v2  }
   0xc   :  { %1577 = vmatpush3.bf16.msra.mxu0 %v1728_v52 }
   0xd   :  { %1578 = vmatprep.subr.bf16.mxu0 %v1760_v6 }
   0xf   :  { %1719 = vset.pattern.permute.xlu1 %v1758_v1  ;;  %1720 = vset.pattern.permute.xlu0 %v1758_v1 }
  0x10   :  { %1579 = vmatpush3.bf16.msra.mxu0 %v1729_v53  ;;  %v360_v53 = vld [vmem:[%s2135_s2 + $0x5] ss:$0 sm:$0xff] }
  0x11   :  { %1580 = vmatprep.subr.bf16.mxu0 %v1760_v6 }
  0x14   :  { %1581 = vmatpush3.bf16.msra.mxu0 %v1730_v54 }
  0x15   :  { %1600 = vmatprep.subr.bf16.mxu0 %v1760_v6 }
  0x81   :  { %v1825_v13 = vpop.permute.xlu1 %36  ;;  %v1827_v14 = vpop.permute.xlu0 %21 }
  0x82   :  { %v47_v21 = vmul.f32 %v46_v16, %v1825_v13  ;;  %v33_v22 = vmul.f32 %v32_v17, %v1827_v14 }
  0x84   :  { %v49_v27 = vadd.f32 %v47_v21, %v33_v22 }
  0x85   :  { %v1832_v18 = vpop.permute.xlu1 %40  ;;  %v1834_v19 = vpop.permute.xlu0 %26 }
  0x86   :  { %v48_v23 = vmul.f32 %v46_v16, %v1832_v18  ;;  %v34_v24 = vmul.f32 %v32_v17, %v1834_v19 }
  0x88   :  { %v50_v28 = vadd.f32 %v48_v23, %v34_v24 }
  0x8a   :  { %v1842_v25 = vpop.permute.xlu1 %56  ;;  %v1844_v26 = vpop.permute.xlu0 %52 }
  0x8b   :  { %v64_v29 = vmul.f32 %v62_v20, %v1842_v25  ;;  %v63_v30 = vmul.f32 %v62_v20, %v1844_v26 }
  0x8d   :  { %v66_v32 = vadd.f32 %v64_v29, %v50_v28  ;;  %v65_v33 = vadd.f32 %v63_v30, %v49_v27 }
  0x8f   :  { %v69_v34 = vadd.f32 %v67_v31, %v66_v32  ;;  %v68_v35 = vadd.f32 %v67_v31, %v65_v33 }
  0x91   :  { %v71_v36 = vmax.f32 %v69_v34, 0.0  ;;  %v70_v37 = vmax.f32 %v68_v35, 0.0  ;;  %v1731_v34 = vld [vmem:[%s2134_s1 + $0x80] ss:$8 sps:$4 sm:$0xff]   ;;  %v1732_v35 = vld [vmem:[%s2134_s1 + $0x90] ss:$8 sps:$4 sm:$0xff]  }
  0x93   :  { %v72_v38 = vpack.c.bf16 %v71_v36, %v70_v37  ;;  %v219_v36 = vld [vmem:[%s2135_s2 + $0x3] ss:$0 sm:$0xff] }
  0x95   :  { %1563 = vmatmul.mubr.msk.bf16.vlgmr.msra.gmra.mrb[0].mxu1 %vm82_vm1, %v72_v38 }
  0x96   :  { %1570 = vmatprep.mubr.msk.bf16.mxu1 %vm1761_vm0, %v1760_v6  ;;  %1567 = vmatpush3.bf16.msra.mxu1 %v1725_v39 }
  0x97   :  { %1568 = vmatprep.subr.bf16.mxu1 %v1760_v6 }
  0x9a   :  { %1569 = vmatpush3.bf16.msra.mxu1 %v1726_v40 }
  0x9b   :  { %1586 = vmatprep.subr.bf16.mxu1 %v1760_v6 }
 0x168   :  { %v120_v42 = vpop.f32.mrb[0].mxu1 }
 0x169   :  { %v121_v43 = vadd.f32 %v120_v42, %v75_v41  ;;  %v1564_v44 = vpop.f32.mrb[1].mxu1 }
 0x16a   :  { %v123_v45 = vpop.f32.mrb[2].mxu1  ;;  %v1733_v44 = vld [vmem:[%s2134_s1 + $0xa0] ss:$8 sps:$4 sm:$0xff]  }
 0x16b   :  { %v124_v46 = vadd.f32 %v123_v45, %v75_v41  ;;  %v1565_v47 = vpop.f32.mrb[3].mxu1  ;;  %v127_v48 = vmax.f32 %v121_v43, 0.0  ;;  %v300_v45 = vld [vmem:[%s2135_s2 + $0x4] ss:$0 sm:$0xff] }
 0x16d   :  { %v128_v49 = vmax.f32 %v124_v46, 0.0 }
 0x16f   :  { %v129_v50 = vpack.c.bf16 %v128_v49, %v127_v48 }
 0x171   :  { %1571 = vmatmul.mubr.msk.bf16.vlgmr.msra.gmra.mrb[4].mxu1 %vm147_vm2, %v129_v50 }
 0x172   :  { %1590 = vmatprep.mubr.msk.bf16.mxu1 %vm1761_vm0, %v1760_v6  ;;  %1587 = vmatpush3.bf16.msra.mxu1 %v1731_v34 }
 0x173   :  { %1588 = vmatprep.subr.bf16.mxu1 %v1760_v6 }
 0x176   :  { %1589 = vmatpush3.bf16.msra.mxu1 %v1732_v35  ;;  %v494_v35 = vld [vmem:[%s2135_s2 + $0x14] ss:$0 sm:$0xff] }
 0x177   :  { %1594 = vmatprep.subr.bf16.mxu1 %v1760_v6 }
 0x244   :  { %v185_v56 = vpop.f32.mrb[4].mxu1 }
 0x245   :  { %v186_v57 = vadd.f32 %v185_v56, %v134_v55  ;;  %v1572_v58 = vpop.f32.mrb[5].mxu1 }
 0x246   :  { %v188_v59 = vpop.f32.mrb[6].mxu1 }
 0x247   :  { %v192_v60 = vmax.f32 %v186_v57, 0.0  ;;  %v189_v61 = vadd.f32 %v188_v59, %v134_v55  ;;  %v1573_v62 = vpop.f32.mrb[7].mxu1 }
 0x249   :  { %v195_v63 = vsel %vm194_vm3, %v192_v60, -inf  ;;  %v193_v2 = vmax.f32 %v189_v61, 0.0 }
 0x24a   :  { %v196_v3 = vrot.slane %v195_v63, 4 }
 0x24b   :  { %v202_v5 = vsel %vm194_vm3, %v193_v2, -inf }
 0x24c   :  { %v197_v7 = vmax.f32 %v195_v63, %v196_v3  ;;  %v203_v9 = vrot.slane %v202_v5, 4 }
 0x24e   :  { %v198_v10 = vrot.slane %v197_v7, 2  ;;  %v204_v16 = vmax.f32 %v202_v5, %v203_v9 }
 0x250   :  { %v199_v17 = vmax.f32 %v197_v7, %v198_v10  ;;  %v205_v20 = vrot.slane %v204_v16, 2 }
 0x252   :  { %v200_v21 = vrot.slane %v199_v17, 1  ;;  %v206_v22 = vmax.f32 %v204_v16, %v205_v20 }
 0x254   :  { %v201_v23 = vmax.f32 %v199_v17, %v200_v21  ;;  %v207_v24 = vrot.slane %v206_v22, 1 }
 0x256   :  { %v209_v27 = vpack.c.bf16 %v201_v23, %v201_v23  ;;  %v208_v28 = vmax.f32 %v206_v22, %v207_v24 }
 0x258   :  { %v210_v29 = vpack.c.bf16 %v208_v28, %v208_v28  ;;  %v222_v30 = vunpack.c.l.b16 %v209_v27 }
 0x25a   :  { %v223_v31 = vunpack.c.l.b16 %v210_v29 }
 0x25c   :  { %v225_v32 = vsel %vm224_vm4, %v223_v31, %v222_v30 }
 0x25d   :  { %v226_v33 = vpack.c.b16 %v225_v32, %v225_v32 }
 0x25f   :  { %1583 = vmatmul.mubr.msk.bf16.vlgmr.msra.gmra.mrb[0].mxu0 %vm194_vm3, %v226_v33 }
 0x260   :  { %1602 = vmatprep.mubr.msk.bf16.mxu0 %vm1761_vm0, %v1760_v6 }
 0x332   :  { %v288_v37 = vpop.f32.mrb[0].mxu0 }
 0x333   :  { %v289_v38 = vadd.f32 %v288_v37, %v219_v36  ;;  %v1584_v39 = vpop.f32.mrb[1].mxu0 }
 0x334   :  { %v291_v40 = vpop.f32.mrb[2].mxu0 }
 0x335   :  { %v294_v41 = vmax.f32 %v289_v38, 0.0  ;;  %v1585_v42 = vpop.f32.mrb[3].mxu0 }
 0x337   :  { %v295_v43 = vpack.c.bf16 %v294_v41, %v294_v41 }
 0x339   :  { %1591 = vmatmul.mubr.msk.bf16.vlgmr.msra.gmra.mrb[8].mxu1 %vm147_vm2, %v295_v43  ;;  %v1735_v43 = vld [vmem:[%s2134_s1 + $0xc0] ss:$8 sps:$4 sm:$0xff]  }
 0x33a   :  { %1596 = vmatprep.mubr.msk.bf16.mxu1 %vm1761_vm0, %v1760_v6  ;;  %1595 = vmatpush3.bf16.msra.mxu1 %v1733_v44  ;;  %v502_v44 = vld [vmem:[%s2135_s2 + $0x6] ss:$0 sm:$0xff] }
 0x33b   :  { %1606 = vmatprep.subr.bf16.mxu1 %v1760_v6 }
 0x40c   :  { %v350_v46 = vpop.f32.mrb[8].mxu1 }
 0x40d   :  { %v351_v47 = vadd.f32 %v350_v46, %v300_v45  ;;  %v1592_v48 = vpop.f32.mrb[9].mxu1 }
 0x40e   :  { %v353_v49 = vpop.f32.mrb[10].mxu1 }
 0x40f   :  { %v356_v50 = vmax.f32 %v351_v47, 0.0  ;;  %v1593_v51 = vpop.f32.mrb[11].mxu1 }
 0x411   :  { %v357_v52 = vpack.c.bf16 %v356_v50, %v356_v50 }
 0x413   :  { %1597 = vmatmul.mubr.msk.bf16.vlgmr.msra.gmra.mrb[12].mxu1 %vm82_vm1, %v357_v52 }
 0x414   :  { %1608 = vmatprep.mubr.msk.bf16.mxu1 %vm1761_vm0, %v1760_v6  ;;  %1607 = vmatpush3.bf16.msra.mxu1 %v1735_v43  ;;  %v1742_v43 = vld [vmem:[%s2134_s1 + $0x130] ss:$8 sps:$4 sm:$0xff]  }
 0x415   :  { %1620 = vmatprep.subr.bf16.mxu1 %v1760_v6 }
 0x4e6   :  { %v404_v54 = vpop.f32.mrb[12].mxu1 }
 0x4e7   :  { %v405_v55 = vadd.f32 %v404_v54, %v360_v53  ;;  %v1598_v56 = vpop.f32.mrb[13].mxu1  ;;  %v1736_v54 = vld [vmem:[%s2134_s1 + $0xd0] ss:$8 sps:$4 sm:$0xff]  }
 0x4e8   :  { %v407_v57 = vpop.f32.mrb[14].mxu1  ;;  %v558_v56 = vld [vmem:[%s2135_s2 + $0x7] ss:$0 sm:$0xff] }
 0x4e9   :  { %v413_v58 = vrot.slane %v405_v55, %v1823_v12  ;;  %v430_v59 = vrot.slane %v405_v55, %v1820_v11  ;;  %v1599_v60 = vpop.f32.mrb[15].mxu1  ;;  %v1737_v55 = vld [vmem:[%s2134_s1 + $0xe0] ss:$8 sps:$4 sm:$0xff]  }
 0x4eb   :  { %v432_v61 = vmul.f32 %v430_v59, %v1832_v18  ;;  %v415_v62 = vmul.f32 %v413_v58, %v1825_v13  ;;  %v438_v63 = vmul.f32 %v430_v59, %v1842_v25  ;;  %v421_v2 = vmul.f32 %v413_v58, %v1844_v26 }
 0x4ec   :  { %v431_v7 = vmul.f32 %v430_v59, %v1834_v19  ;;  %v414_v9 = vmul.f32 %v413_v58, %v1827_v14  ;;  %v1734_v14 = vld [vmem:[%s2134_s1 + $0xb0] ss:$8 sps:$4 sm:$0xff]   ;;  %v444_v19 = vld [vmem:[%s2134_s1 + $0x160] sm:$0x3] }
 0x4ed   :  { %434 = vrot.lane.b32.xlu0 %v432_v61, %s1762_s21  ;;  %417 = vrot.lane.b32.xlu1 %v415_v62, %s1762_s21  ;;  %v445_v25 = vunpack.c.l.bf16 %v444_v19 }
 0x4ee   :  { %1601 = vmatpush3.bf16.msra.mxu0 %v1734_v14 }
 0x4ef   :  { %1612 = vmatprep.subr.bf16.mxu0 %v1760_v6  ;;  %v473_v21 = vrot.slane %v445_v25, %v1820_v11  ;;  %v459_v22 = vrot.slane %v445_v25, %v1823_v12  ;;  %v489_v27 = vrot.slane %v445_v25, %v61_v15 }
 0x4f1   :  { %440 = vrot.lane.b32.xlu0 %v438_v63, %s1763_s22  ;;  %423 = vrot.lane.b32.xlu1 %v421_v2, %s1763_s22 }
 0x55f   :  { %v435_v3 = vpop.permute.xlu0 %434  ;;  %v418_v5 = vpop.permute.xlu1 %417 }
 0x560   :  { %v437_v10 = vadd.f32 %v435_v3, %v431_v7  ;;  %v420_v18 = vadd.f32 %v418_v5, %v414_v9  ;;  %v1738_v5 = vld [vmem:[%s2134_s1 + $0xf0] ss:$8 sps:$4 sm:$0xff]   ;;  %v1739_v7 = vld [vmem:[%s2134_s1 + $0x100] ss:$8 sps:$4 sm:$0xff]  }
 0x561   :  { %v1740_v9 = vld [vmem:[%s2134_s1 + $0x110] ss:$8 sps:$4 sm:$0xff]  }
 0x563   :  { %v441_v16 = vpop.permute.xlu0 %440  ;;  %v424_v13 = vpop.permute.xlu1 %423 }
 0x564   :  { %v443_v17 = vadd.f32 %v441_v16, %v437_v10  ;;  %v426_v20 = vadd.f32 %v424_v13, %v420_v18  ;;  %v1741_v10 = vld [vmem:[%s2134_s1 + $0x120] ss:$8 sps:$4 sm:$0xff]   ;;  %v616_v18 = vld [vmem:[%s2135_s2 + $0x10] ss:$0 sm:$0xff] }
 0x566   :  { %453 = vperm.xlu0 %1720, %v443_v17   ;;  %448 = vperm.xlu1 %1719, %v426_v20  }
 0x56a   :  { %1722 = vset.pattern.permute.xlu0 %v1759_v4  ;;  %1721 = vset.pattern.permute.xlu1 %v1757_v0 }
 0x56b   :  { %479 = vperm.xlu0 %1722, %v426_v20   ;;  %463 = vperm.xlu1 %1721, %v426_v20  }
 0x56f   :  { %467 = vperm.xlu1 %1721, %v443_v17  }
 0x573   :  { %1723 = vset.pattern.permute.xlu1 %v1759_v4 }
 0x574   :  { %483 = vperm.xlu1 %1723, %v443_v17  }
 0x5e5   :  { %v449_v26 = vpop.permute.xlu1 %448  ;;  %v454_v0 = vpop.permute.xlu0 %453 }
 0x5e6   :  { %v460_v24 = vmul.f32 %v459_v22, %v449_v26  ;;  %v461_v33 = vmul.f32 %v459_v22, %v454_v0 }
 0x5ea   :  { %v464_v4 = vpop.permute.xlu1 %463  ;;  %v480_v28 = vpop.permute.xlu0 %479 }
 0x5eb   :  { %v474_v23 = vmul.f32 %v473_v21, %v464_v4  ;;  %v490_v31 = vmul.f32 %v489_v27, %v480_v28 }
 0x5ed   :  { %v476_v29 = vadd.f32 %v474_v23, %v460_v24 }
 0x5ee   :  { %v468_v30 = vpop.permute.xlu1 %467 }
 0x5ef   :  { %v475_v32 = vmul.f32 %v473_v21, %v468_v30  ;;  %v492_v34 = vadd.f32 %v490_v31, %v476_v29 }
 0x5f1   :  { %v477_v37 = vadd.f32 %v475_v32, %v461_v33  ;;  %v1945_v39 = vadd.f32 %v494_v35, %v492_v34 }
 0x5f3   :  { %v484_v36 = vpop.permute.xlu1 %483  ;;  %v497_v8 = vmax.f32 %v1945_v39, 0.0 }
 0x5f4   :  { %v491_v38 = vmul.f32 %v489_v27, %v484_v36 }
 0x5f6   :  { %v493_v40 = vadd.f32 %v491_v38, %v477_v37 }
 0x5f8   :  { %v1947_v41 = vadd.f32 %v494_v35, %v493_v40 }
 0x5fa   :  { %v498_v15 = vmax.f32 %v1947_v41, 0.0 }
 0x5fc   :  { %v499_v42 = vpack.c.bf16 %v498_v15, %v497_v8 }
 0x5fe   :  { %1603 = vmatmul.mubr.msk.bf16.vlgmr.msra.gmra.mrb[4].mxu0 %vm82_vm1, %v499_v42 }
 0x5ff   :  { %1616 = vmatprep.mubr.msk.bf16.mxu0 %vm1761_vm0, %v1760_v6  ;;  %1613 = vmatpush3.bf16.msra.mxu0 %v1736_v54  ;;  %v1744_v54 = vld [vmem:[%s2134_s1 + $0x150] ss:$8 sps:$4 sm:$0xff]  }
 0x600   :  { %1614 = vmatprep.subr.bf16.mxu0 %v1760_v6 }
 0x603   :  { %1615 = vmatpush3.bf16.msra.mxu0 %v1737_v55  ;;  %v779_v55 = vld [vmem:[%s2135_s2 + $0x12] ss:$0 sm:$0xff] }
 0x604   :  { %1632 = vmatprep.subr.bf16.mxu0 %v1760_v6 }
 0x6d1   :  { %v546_v45 = vpop.f32.mrb[4].mxu0 }
 0x6d2   :  { %v547_v46 = vadd.f32 %v546_v45, %v502_v44  ;;  %v1604_v47 = vpop.f32.mrb[5].mxu0  ;;  %v699_v45 = vld [vmem:[%s2135_s2 + $0x11] ss:$0 sm:$0xff] }
 0x6d3   :  { %v549_v48 = vpop.f32.mrb[6].mxu0 }
 0x6d4   :  { %v550_v49 = vadd.f32 %v549_v48, %v502_v44  ;;  %v1605_v50 = vpop.f32.mrb[7].mxu0  ;;  %v553_v51 = vmax.f32 %v547_v46, 0.0  ;;  %v1743_v44 = vld [vmem:[%s2134_s1 + $0x140] ss:$8 sps:$4 sm:$0xff]  }
 0x6d6   :  { %v554_v52 = vmax.f32 %v550_v49, 0.0 }
 0x6d8   :  { %v555_v53 = vpack.c.bf16 %v554_v52, %v553_v51 }
 0x6da   :  { %1609 = vmatmul.mubr.msk.bf16.vlgmr.msra.gmra.mrb[16].mxu1 %vm82_vm1, %v555_v53  ;;  %v1746_v53 = vld [vmem:[%s2134_s1 + $0x154] ss:$8 sps:$4 sm:$0xff]  }
 0x6db   :  { %1628 = vmatprep.mubr.msk.bf16.mxu1 %vm1761_vm0, %v1760_v6  ;;  %1621 = vmatpush3.bf16.msra.mxu1 %v1738_v5 }
 0x6dc   :  { %1622 = vmatprep.subr.bf16.mxu1 %v1760_v6 }
 0x6df   :  { %1623 = vmatpush3.bf16.msra.mxu1 %v1739_v7 }
 0x6e0   :  { %1624 = vmatprep.subr.bf16.mxu1 %v1760_v6 }
 0x6e3   :  { %1625 = vmatpush3.bf16.msra.mxu1 %v1740_v9 }
 0x6e4   :  { %1626 = vmatprep.subr.bf16.mxu1 %v1760_v6 }
 0x6e7   :  { %1627 = vmatpush3.bf16.msra.mxu1 %v1741_v10 }
 0x7ad   :  { %v602_v57 = vpop.f32.mrb[16].mxu1 }
 0x7ae   :  { %v603_v58 = vadd.f32 %v602_v57, %v558_v56  ;;  %v1610_v59 = vpop.f32.mrb[17].mxu1 }
 0x7af   :  { %v605_v60 = vpop.f32.mrb[18].mxu1 }
 0x7b0   :  { %v606_v61 = vadd.f32 %v605_v60, %v558_v56  ;;  %v1611_v62 = vpop.f32.mrb[19].mxu1  ;;  %v609_v63 = vmax.f32 %v603_v58, 0.0 }
 0x7b1   :  { %v1488_v62 = vld [vmem:[%s2135_s2 + $0x13] ss:$8 sm:$0x3] }
 0x7b2   :  { %v610_v2 = vmax.f32 %v606_v61, 0.0 }
 0x7b4   :  { %v611_v3 = vpack.c.bf16 %v610_v2, %v609_v63  ;;  %v845_v63 = vrot.slane %v1488_v62, %v1823_v12  ;;  %v849_v2 = vrot.slane %v1488_v62, %v1820_v11  ;;  %v1771_v11 = vmov 0.0|0.0  }
 0x7b5   :  { %1694 = vmatprep.subr.bf16.mxu1 %v1771_v11 }
 0x7b6   :  { %1617 = vmatmul.mubr.msk.bf16.vlgmr.msra.gmra.mrb[8].mxu0 %vm147_vm2, %v611_v3 }
 0x7b7   :  { %1636 = vmatprep.mubr.msk.bf16.mxu0 %vm1761_vm0, %v1760_v6  ;;  %1633 = vmatpush3.bf16.msra.mxu0 %v1742_v43 }
 0x7b8   :  { %1634 = vmatprep.subr.bf16.mxu0 %v1760_v6 }
 0x7bb   :  { %1635 = vmatpush3.bf16.msra.mxu0 %v1743_v44 }
 0x7bc   :  { %865 = vmatprep.subr.bf16.mxu0 %v1746_v53 }
 0x889   :  { %v666_v16 = vpop.f32.mrb[8].mxu0 }
 0x88a   :  { %v667_v13 = vadd.f32 %v666_v16, %v616_v18  ;;  %v1618_v17 = vpop.f32.mrb[9].mxu0 }
 0x88b   :  { %v669_v20 = vpop.f32.mrb[10].mxu0 }
 0x88c   :  { %v673_v14 = vmax.f32 %v667_v13, 0.0  ;;  %v670_v19 = vadd.f32 %v669_v20, %v616_v18  ;;  %v1619_v25 = vpop.f32.mrb[11].mxu0 }
 0x88e   :  { %v675_v26 = vsel %vm194_vm3, %v673_v14, -inf  ;;  %v674_v0 = vmax.f32 %v670_v19, 0.0 }
 0x88f   :  { %v676_v21 = vrot.slane %v675_v26, 4 }
 0x890   :  { %v682_v22 = vsel %vm194_vm3, %v674_v0, -inf }
 0x891   :  { %v677_v4 = vmax.f32 %v675_v26, %v676_v21  ;;  %v683_v23 = vrot.slane %v682_v22, 4 }
 0x893   :  { %v678_v24 = vrot.slane %v677_v4, 2  ;;  %v684_v27 = vmax.f32 %v682_v22, %v683_v23 }
 0x895   :  { %v679_v28 = vmax.f32 %v677_v4, %v678_v24  ;;  %v685_v29 = vrot.slane %v684_v27, 2 }
 0x897   :  { %v680_v30 = vrot.slane %v679_v28, 1  ;;  %v686_v31 = vmax.f32 %v684_v27, %v685_v29 }
 0x899   :  { %v681_v32 = vmax.f32 %v679_v28, %v680_v30  ;;  %v687_v33 = vrot.slane %v686_v31, 1 }
 0x89b   :  { %v689_v34 = vpack.c.bf16 %v681_v32, %v681_v32  ;;  %v688_v35 = vmax.f32 %v686_v31, %v687_v33  ;;  %v1747_v32 = vld [vmem:[%s2134_s1 + $0x170] ss:$8 sps:$4 sm:$0xff]  }
 0x89d   :  { %v690_v36 = vpack.c.bf16 %v688_v35, %v688_v35  ;;  %v702_v37 = vunpack.c.l.b16 %v689_v34  ;;  %v1749_v35 = vld [vmem:[%s2134_s1 + $0x190] ss:$8 sps:$4 sm:$0xff]  }
 0x89f   :  { %v703_v38 = vunpack.c.l.b16 %v690_v36  ;;  %v1123_v36 = vld [vmem:[%s2135_s2 + $0x15] ss:$0 sm:$0xff] }
 0x8a1   :  { %v704_v40 = vsel %vm224_vm4, %v703_v38, %v702_v37 }
 0x8a2   :  { %v705_v42 = vpack.c.b16 %v704_v40, %v704_v40 }
 0x8a4   :  { %1629 = vmatmul.mubr.msk.bf16.vlgmr.msra.gmra.mrb[20].mxu1 %vm194_vm3, %v705_v42 }
 0x8a5   :  { %1644 = vmatprep.mubr.msk.f32.mxu1 %vm1761_vm0, %v1760_v6 }
 0x977   :  { %v767_v46 = vpop.f32.mrb[20].mxu1 }
 0x978   :  { %v768_v47 = vadd.f32 %v767_v46, %v699_v45  ;;  %v1630_v48 = vpop.f32.mrb[21].mxu1 }
 0x979   :  { %v770_v49 = vpop.f32.mrb[22].mxu1  ;;  %v1750_v48 = vld [vmem:[%s2134_s1 + $0x1a0] ss:$8 sps:$4 sm:$0xff]  }
 0x97a   :  { %v773_v50 = vmax.f32 %v768_v47, 0.0  ;;  %v1631_v51 = vpop.f32.mrb[23].mxu1  ;;  %v1751_v49 = vld [vmem:[%s2134_s1 + $0x1b0] ss:$8 sps:$4 sm:$0xff]  }
 0x97b   :  { %v1753_v51 = vld [vmem:[%s2134_s1 + $0x1d0] ss:$8 sps:$4 sm:$0xff]  }
 0x97c   :  { %v774_v52 = vpack.c.bf16 %v773_v50, %v773_v50  ;;  %v1752_v50 = vld [vmem:[%s2134_s1 + $0x1c0] ss:$8 sps:$4 sm:$0xff]  }
 0x97e   :  { %1637 = vmatmul.mubr.msk.bf16.vlgmr.msra.gmra.mrb[12].mxu0 %vm147_vm2, %v774_v52  ;;  %v1181_v52 = vld [vmem:[%s2135_s2 + $0x16] ss:$0 sm:$0xff] }
 0x97f   :  { %897 = vmatprep.mubr.bf16.mxu0 %v1758_v1  ;;  %866 = vmatpush1.bf16.msra.mxu0 %v1744_v54 }
 0x980   :  { %1697 = vmatprep.subr.bf16.mxu0 %v1771_v11 }
 0xa51   :  { %v829_v56 = vpop.f32.mrb[12].mxu0 }
 0xa52   :  { %v830_v57 = vadd.f32 %v829_v56, %v779_v55  ;;  %v1638_v58 = vpop.f32.mrb[13].mxu0 }
 0xa53   :  { %v832_v59 = vpop.f32.mrb[14].mxu0 }
 0xa54   :  { %v835_v60 = vmax.f32 %v830_v57, 0.0  ;;  %v1639_v1 = vpop.f32.mrb[15].mxu0 }
 0xa56   :  { %v836_v61 = vpack.c.bf16 %v835_v60, %v835_v60 }
 0xa58   :  { %1491 = vmatmul.mubr.msk.bf16.vlgmr.msra.gmra.mrb[16].mxu0 %vm82_vm1, %v836_v61 }
 0xa59   :  { %1651 = vmatprep.mubr.msk.f32.mxu0 %vm1761_vm0, %v1760_v6 }
 0xb2b   :  { %v899_v3 = vpop.f32.mrb[16].mxu0 }
 0xb2c   :  { %v900_v5 = vadd.f32 %v899_v3, %v845_v63  ;;  %v901_v7 = vpop.f32.mrb[17].mxu0 }
 0xb2d   :  { %v902_v9 = vadd.f32 %v901_v7, %v849_v2  ;;  %v903_v10 = vpop.f32.mrb[18].mxu0 }
 0xb2e   :  { %907 = vst.msk [vmem:[#allocation2] sm:$0x3] %vm906_vm5, %v900_v5  ;;  %v904_v18 = vpop.f32.mrb[19].mxu0  ;;  %913 = vrot.lane.b32.xlu0 %v900_v5, %s1764_s8  ;;  %909 = vrot.lane.b32.xlu1 %v900_v5, %s1765_s9 }
 0xb2f   :  { %937 = vst.msk [vmem:[#allocation2 + $0x10] sm:$0x3] %vm906_vm5, %v902_v9 }
 0xb32   :  { %921 = vrot.lane.b32.xlu0 %v900_v5, %s1766_s10  ;;  %917 = vrot.lane.b32.xlu1 %v900_v5, %s1767_s11 }
 0xb36   :  { %929 = vrot.lane.b32.xlu0 %v900_v5, %s1768_s12  ;;  %925 = vrot.lane.b32.xlu1 %v900_v5, %s1769_s13 }
 0xb3a   :  { %939 = vrot.lane.b32.xlu0 %v902_v9, %s1765_s9  ;;  %933 = vrot.lane.b32.xlu1 %v900_v5, %s1770_s14 }
 0xb3e   :  { %947 = vrot.lane.b32.xlu0 %v902_v9, %s1767_s11  ;;  %943 = vrot.lane.b32.xlu1 %v902_v9, %s1764_s8 }
 0xb42   :  { %955 = vrot.lane.b32.xlu0 %v902_v9, %s1769_s13  ;;  %951 = vrot.lane.b32.xlu1 %v902_v9, %s1766_s10 }
 0xb46   :  { %963 = vrot.lane.b32.xlu0 %v902_v9, %s1770_s14  ;;  %959 = vrot.lane.b32.xlu1 %v902_v9, %s1768_s12 }
 0xba0   :  { %v914_v12 = vpop.permute.xlu0 %913  ;;  %v910_v16 = vpop.permute.xlu1 %909 }
 0xba1   :  { %916 = vst.msk [vmem:[#allocation2 + $0x4] sm:$0x3] %vm906_vm5, %v914_v12  ;;  %912 = vst.msk [vmem:[#allocation2 + $0x2] sm:$0x3] %vm906_vm5, %v910_v16 }
 0xba4   :  { %v922_v13 = vpop.permute.xlu0 %921  ;;  %v918_v17 = vpop.permute.xlu1 %917 }
 0xba5   :  { %924 = vst.msk [vmem:[#allocation2 + $0x8] sm:$0x3] %vm906_vm5, %v922_v13  ;;  %920 = vst.msk [vmem:[#allocation2 + $0x6] sm:$0x3] %vm906_vm5, %v918_v17 }
 0xba8   :  { %v930_v20 = vpop.permute.xlu0 %929  ;;  %v926_v14 = vpop.permute.xlu1 %925 }
 0xba9   :  { %932 = vst.msk [vmem:[#allocation2 + $0xc] sm:$0x3] %vm906_vm5, %v930_v20  ;;  %928 = vst.msk [vmem:[#allocation2 + $0xa] sm:$0x3] %vm906_vm5, %v926_v14 }
 0xbac   :  { %v940_v19 = vpop.permute.xlu0 %939  ;;  %v934_v25 = vpop.permute.xlu1 %933 }
 0xbad   :  { %942 = vst.msk [vmem:[#allocation2 + $0x12] sm:$0x3] %vm906_vm5, %v940_v19  ;;  %936 = vst.msk [vmem:[#allocation2 + $0xe] sm:$0x3] %vm906_vm5, %v934_v25  ;;  %v1754_v19 = vld [vmem:[%s2134_s1 + $0x1e0] ss:$8 sps:$4 sm:$0xff]  }
 0xbae   :  { %v1755_v25 = vld [vmem:[%s2134_s1 + $0x1f0] ss:$8 sps:$4 sm:$0xff]  }
 0xbb0   :  { %v948_v26 = vpop.permute.xlu0 %947  ;;  %v944_v0 = vpop.permute.xlu1 %943 }
 0xbb1   :  { %950 = vst.msk [vmem:[#allocation2 + $0x16] sm:$0x3] %vm906_vm5, %v948_v26  ;;  %946 = vst.msk [vmem:[#allocation2 + $0x14] sm:$0x3] %vm906_vm5, %v944_v0  ;;  %v1262_v26 = vld [vmem:[%s2135_s2 + $0x17] ss:$0 sm:$0xff] }
 0xbb4   :  { %v956_v21 = vpop.permute.xlu0 %955  ;;  %v952_v22 = vpop.permute.xlu1 %951  ;;  %v967_v24 = vld [vmem:[#allocation2] ss:$2 sm:$0xff]  ;;  %v1044_v28 = vld [vmem:[#allocation2 + $0x1] ss:$2 sm:$0xff] }
 0xbb5   :  { %958 = vst.msk [vmem:[#allocation2 + $0x1a] sm:$0x3] %vm906_vm5, %v956_v21  ;;  %954 = vst.msk [vmem:[#allocation2 + $0x18] sm:$0x3] %vm906_vm5, %v952_v22 }
 0xbb8   :  { %v964_v4 = vpop.permute.xlu0 %963  ;;  %v960_v23 = vpop.permute.xlu1 %959 }
 0xbb9   :  { %966 = vst.msk [vmem:[#allocation2 + $0x1e] sm:$0x3] %vm906_vm5, %v964_v4  ;;  %962 = vst.msk [vmem:[#allocation2 + $0x1c] sm:$0x3] %vm906_vm5, %v960_v23 }
 0xbc0   :  { %v969_v27 = vld [vmem:[#allocation2 + $0x10] ss:$2 sm:$0xff]  ;;  %v1046_v29 = vld [vmem:[#allocation2 + $0x11] ss:$2 sm:$0xff] }
 0xbc1   :  { %v1695_v30 = vpack.c.bf16 %v969_v27, %v967_v24  ;;  %v1698_v31 = vpack.c.bf16 %v1046_v29, %v1044_v28  ;;  %v1756_v28 = vld [vmem:[%s2134_s1 + $0x200] ss:$8 sps:$4 sm:$0xff]  }
 0xbc2   :  { %v1342_v29 = vld [vmem:[%s2135_s2 + $0x20] ss:$0 sm:$0xff] }
 0xbc3   :  { %1696 = vmatpush3.bf16.msra.mxu1 %v1695_v30  ;;  %1699 = vmatpush3.bf16.msra.mxu0 %v1698_v31 }
 0xbc4   :  { %1654 = vmatprep.subr.bf16.mxu1 %v1760_v6  ;;  %1660 = vmatprep.subr.bf16.mxu0 %v1760_v6 }
 0xbc6   :  { %1645 = vmatmul.mubr.msk.f32.vlgmr.msra.gmra.mrb[24].mxu1 %vm82_vm1, %v497_v8  ;;  %1652 = vmatmul.mubr.msk.f32.vlgmr.msra.gmra.mrb[20].mxu0 %vm82_vm1, %v498_v15  ;;  %v1748_v15 = vld [vmem:[%s2134_s1 + $0x180] ss:$8 sps:$4 sm:$0xff]  }
 0xbc7   :  { %1656 = vmatprep.mubr.msk.bf16.mxu1 %vm1761_vm0, %v1760_v6  ;;  %1664 = vmatprep.mubr.msk.bf16.mxu0 %vm1761_vm0, %v1760_v6 }
 0xbc8   :  { %1655 = vmatpush3.bf16.msra.mxu1 %v1747_v32  ;;  %1661 = vmatpush3.bf16.msra.mxu0 %v1748_v15 }
 0xbc9   :  { %1668 = vmatprep.subr.bf16.mxu1 %v1760_v6  ;;  %1662 = vmatprep.subr.bf16.mxu0 %v1760_v6 }
 0xbcc   :  { %1663 = vmatpush3.bf16.msra.mxu0 %v1749_v35 }
 0xbcd   :  { %1680 = vmatprep.subr.bf16.mxu0 %v1760_v6 }
 0xc99   :  { %v1039_v39 = vpop.f32.mrb[24].mxu1  ;;  %v1116_v33 = vpop.f32.mrb[20].mxu0 }
 0xc9a   :  { %v1120_v8 = vpack.c.bf16 %v1116_v33, %v1039_v39  ;;  %v1646_v34 = vpop.f32.mrb[25].mxu1  ;;  %v1653_v41 = vpop.f32.mrb[21].mxu0 }
 0xc9c   :  { %1657 = vmatmul.mubr.msk.bf16.vlgmr.msra.gmra.mrb[28].mxu1 %vm82_vm1, %v1120_v8 }
 0xc9d   :  { %1676 = vmatprep.mubr.msk.bf16.mxu1 %vm1761_vm0, %v1760_v6  ;;  %1669 = vmatpush3.bf16.msra.mxu1 %v1750_v48 }
 0xc9e   :  { %1670 = vmatprep.subr.bf16.mxu1 %v1760_v6 }
 0xca1   :  { %1671 = vmatpush3.bf16.msra.mxu1 %v1751_v49 }
 0xca2   :  { %1672 = vmatprep.subr.bf16.mxu1 %v1760_v6 }
 0xca5   :  { %1673 = vmatpush3.bf16.msra.mxu1 %v1752_v50 }
 0xca6   :  { %1674 = vmatprep.subr.bf16.mxu1 %v1760_v6 }
 0xca9   :  { %1675 = vmatpush3.bf16.msra.mxu1 %v1753_v51 }
 0xd6f   :  { %v1167_v37 = vpop.f32.mrb[28].mxu1 }
 0xd70   :  { %v1168_v38 = vadd.f32 %v1167_v37, %v1123_v36  ;;  %v1658_v40 = vpop.f32.mrb[29].mxu1 }
 0xd71   :  { %v1170_v42 = vpop.f32.mrb[30].mxu1 }
 0xd72   :  { %v1171_v43 = vadd.f32 %v1170_v42, %v1123_v36  ;;  %v1659_v44 = vpop.f32.mrb[31].mxu1  ;;  %v1174_v45 = vmax.f32 %v1168_v38, 0.0 }
 0xd74   :  { %v1175_v46 = vmax.f32 %v1171_v43, 0.0 }
 0xd76   :  { %v1176_v47 = vpack.c.bf16 %v1175_v46, %v1174_v45 }
 0xd78   :  { %1665 = vmatmul.mubr.msk.bf16.vlgmr.msra.gmra.mrb[24].mxu0 %vm147_vm2, %v1176_v47 }
 0xd79   :  { %1684 = vmatprep.mubr.msk.bf16.mxu0 %vm1761_vm0, %v1760_v6  ;;  %1681 = vmatpush3.bf16.msra.mxu0 %v1754_v19 }
 0xd7a   :  { %1682 = vmatprep.subr.bf16.mxu0 %v1760_v6 }
 0xd7d   :  { %1683 = vmatpush3.bf16.msra.mxu0 %v1755_v25 }
 0xd7e   :  { %1688 = vmatprep.subr.bf16.mxu0 %v1760_v6 }
 0xe4b   :  { %v1231_v53 = vpop.f32.mrb[24].mxu0 }
 0xe4c   :  { %v1232_v54 = vadd.f32 %v1231_v53, %v1181_v52  ;;  %v1666_v55 = vpop.f32.mrb[25].mxu0 }
 0xe4d   :  { %v1234_v56 = vpop.f32.mrb[26].mxu0 }
 0xe4e   :  { %v1238_v57 = vsel %vm194_vm3, %v1232_v54, -inf  ;;  %v1235_v58 = vadd.f32 %v1234_v56, %v1181_v52  ;;  %v1667_v59 = vpop.f32.mrb[27].mxu0 }
 0xe4f   :  { %v1239_v60 = vrot.slane %v1238_v57, 4 }
 0xe50   :  { %v1245_v1 = vsel %vm194_vm3, %v1235_v58, -inf }
 0xe51   :  { %v1240_v61 = vmax.f32 %v1238_v57, %v1239_v60  ;;  %v1246_v62 = vrot.slane %v1245_v1, 4 }
 0xe53   :  { %v1241_v63 = vrot.slane %v1240_v61, 2  ;;  %v1247_v2 = vmax.f32 %v1245_v1, %v1246_v62 }
 0xe55   :  { %v1242_v3 = vmax.f32 %v1240_v61, %v1241_v63  ;;  %v1248_v5 = vrot.slane %v1247_v2, 2 }
 0xe57   :  { %v1243_v7 = vrot.slane %v1242_v3, 1  ;;  %v1249_v9 = vmax.f32 %v1247_v2, %v1248_v5 }
 0xe59   :  { %v1244_v10 = vmax.f32 %v1242_v3, %v1243_v7  ;;  %v1250_v18 = vrot.slane %v1249_v9, 1 }
 0xe5b   :  { %v1252_v11 = vpack.c.bf16 %v1244_v10, %v1244_v10  ;;  %v1251_v12 = vmax.f32 %v1249_v9, %v1250_v18 }
 0xe5d   :  { %v1253_v16 = vpack.c.bf16 %v1251_v12, %v1251_v12  ;;  %v1265_v13 = vunpack.c.l.b16 %v1252_v11 }
 0xe5f   :  { %v1266_v17 = vunpack.c.l.b16 %v1253_v16 }
 0xe61   :  { %v1267_v20 = vsel %vm224_vm4, %v1266_v17, %v1265_v13 }
 0xe62   :  { %v1268_v14 = vpack.c.b16 %v1267_v20, %v1267_v20 }
 0xe64   :  { %1677 = vmatmul.mubr.msk.bf16.vlgmr.msra.gmra.mrb[32].mxu1 %vm194_vm3, %v1268_v14 }
 0xf37   :  { %v1330_v0 = vpop.f32.mrb[32].mxu1 }
 0xf38   :  { %v1331_v21 = vadd.f32 %v1330_v0, %v1262_v26  ;;  %v1678_v22 = vpop.f32.mrb[33].mxu1 }
 0xf39   :  { %v1333_v4 = vpop.f32.mrb[34].mxu1 }
 0xf3a   :  { %v1336_v23 = vmax.f32 %v1331_v21, 0.0  ;;  %v1679_v24 = vpop.f32.mrb[35].mxu1 }
 0xf3c   :  { %v1337_v27 = vpack.c.bf16 %v1336_v23, %v1336_v23 }
 0xf3e   :  { %1685 = vmatmul.mubr.msk.bf16.vlgmr.msra.gmra.mrb[28].mxu0 %vm147_vm2, %v1337_v27 }
 0xf3f   :  { %1690 = vmatprep.mubr.msk.bf16.mxu0 %vm1761_vm0, %v1760_v6  ;;  %1689 = vmatpush3.bf16.msra.mxu0 %v1756_v28  ;;  %v1402_v6 = vld [vmem:[%s2135_s2 + $0x21] ss:$0 sm:$0xff] }
0x1011   :  { %v1392_v30 = vpop.f32.mrb[28].mxu0 }
0x1012   :  { %v1393_v31 = vadd.f32 %v1392_v30, %v1342_v29  ;;  %v1686_v32 = vpop.f32.mrb[29].mxu0 }
0x1013   :  { %v1395_v39 = vpop.f32.mrb[30].mxu0 }
0x1014   :  { %v1398_v33 = vmax.f32 %v1393_v31, 0.0  ;;  %v1687_v8 = vpop.f32.mrb[31].mxu0 }
0x1016   :  { %v1399_v34 = vpack.c.bf16 %v1398_v33, %v1398_v33 }
0x1018   :  { %1691 = vmatmul.mubr.msk.bf16.vlgmr.msra.gmra.mrb[32].mxu0 %vm82_vm1, %v1399_v34 }
0x10eb   :  { %v1446_v41 = vpop.f32.mrb[32].mxu0 }
0x10ec   :  { %v1447_v15 = vadd.f32 %v1446_v41, %v1402_v6  ;;  %v1692_v35 = vpop.f32.mrb[33].mxu0 }
0x10ed   :  { %v1449_v36 = vpop.f32.mrb[34].mxu0 }
0x10ee   :  { %1453 = vst.msk [vmem:[%s2136_s3] sm:$0x3] %vm1452_vm6, %v1447_v15  ;;  %v1693_v37 = vpop.f32.mrb[35].mxu0 }

</bundles_post_ra>
